<compile_context>
chip_gen: v7x
topology: tpu7x:2x2x1
jax: 0.10.0
libtpu: 0.0.40
codegen_flags: <defaults>
</compile_context>

<pallas_src>
import jax
import jax.numpy as jnp
from jax.experimental import pallas as pl
from jax.experimental.pallas import tpu as pltpu


LEAKY_SLOPE = 0.2
LANE = 128
SUBLANE = 8


def _round_up(x, m):
    return ((x + m - 1) // m) * m


def _cdiv(a, b):
    return (a + b - 1) // b


# ---------------------------------------------------------------------------
# Kernel
# ---------------------------------------------------------------------------
def _discriminator_kernel(x_ref,
                          w0_ref, b0_ref,
                          w1_ref, b1_ref,
                          w2_ref, b2_ref,
                          w3_ref, b3_ref,
                          w4_ref, b4_ref,
                          o_ref):
    """Feature-major MLP: h is (features, TB); batch = lane dim."""

    def dense_t(w_ref, b_ref, h):
        # (N_pad, K) bf16 @ (K, TB) bf16 -> (N_pad, TB) f32, + (N_pad, 1) bias.
        return jnp.dot(w_ref[...], h.astype(jnp.bfloat16),
                       preferred_element_type=jnp.float32) + b_ref[...]

    def leaky(y):
        # max(y, 0.2*y) == LeakyReLU(0.2) since slope < 1 (mul + max, no select).
        return jnp.maximum(y, LEAKY_SLOPE * y)

    h = x_ref[...]                                # (in_features, TB) bf16
    h = leaky(dense_t(w0_ref, b0_ref, h))         # hidden0 (Dropout == identity)
    h = leaky(dense_t(w1_ref, b1_ref, h))         # hidden1
    h = leaky(dense_t(w2_ref, b2_ref, h))         # hidden2
    h = leaky(dense_t(w3_ref, b3_ref, h))         # hidden3
    logits = dense_t(w4_ref, b4_ref, h)           # (128, TB); row 0 is the real out

    z = logits[0:1, :]                            # (1, TB) static sublane slice
    o_ref[0] = 1.0 / (1.0 + jnp.exp(-z))          # exact sigmoid, lane-dense store


# ---------------------------------------------------------------------------
# Parameters
# ---------------------------------------------------------------------------
def layer_dims(rows, columns):
    in_features = rows * columns
    return [
        in_features,
        int(in_features * 1.2),
        int(in_features * 1.0),
        int(in_features * 0.8),
        int(in_features * 0.5),
        1,
    ]


def init_discriminator_params(key, rows, columns):
    """Deterministic init mimicking nn.Linear default (uniform +-1/sqrt(fan_in)).

    Weights are stored in the native PyTorch layout (out_features, in_features);
    the kernel consumes them directly as the LHS of W @ h_T.
    """
    dims = layer_dims(rows, columns)
    params = []
    for i in range(5):
        fan_in, fan_out = dims[i], dims[i + 1]
        key, kw, kb = jax.random.split(key, 3)
        bound = 1.0 / float(fan_in) ** 0.5
        w = jax.random.uniform(kw, (fan_out, fan_in), jnp.float32, -bound, bound)
        b = jax.random.uniform(kb, (fan_out,), jnp.float32, -bound, bound)
        params.append((w, b))
    return params


def pack_params(params):
    """Zero-pad output widths to 128; cast weights to bf16; biases stay f32.

    Layer 0 keeps K == in_features (no feature padding of x needed).  Padded
    output rows carry zero bias -> LeakyReLU(0) = 0 -> they feed the (also
    zero-padded) K columns of the next layer, so padding is numerically inert.
    """
    packed = []
    k_pad = params[0][0].shape[1]          # layer-0 K = in_features, unpadded
    for w, b in params:
        fo, fi = w.shape
        fo_p = _round_up(fo, LANE)
        w_p = jnp.zeros((fo_p, k_pad), jnp.bfloat16).at[:fo, :fi].set(
            w.astype(jnp.bfloat16))
        b_p = jnp.zeros((fo_p, 1), jnp.float32).at[:fo, 0].set(b)
        packed.append((w_p, b_p))
        k_pad = fo_p                       # next layer's K = this padded width
    return packed


# ---------------------------------------------------------------------------
# Wrapper
# ---------------------------------------------------------------------------
def _pick_batch_tile(B, batch_tile):
    """Batch tile: lane dim of every block, so a multiple of 128 (or = full pad).

    Tiny batches run as a single full-array block; otherwise aim for >= 2 grid
    steps (v7x megacore sharding) while bounding padding waste to < 1 tile.
    """
    b8 = _round_up(B, SUBLANE)
    if b8 <= LANE:
        return b8                                   # single step, block == array
    max_tile = max(LANE, _round_up(batch_tile, LANE))
    n_steps = max(2, _cdiv(B, max_tile))
    return min(max_tile, _round_up(_cdiv(B, n_steps), LANE))


def ganeraid_discriminator_forward(x, packed_params, *, batch_tile=512):
    """x: (B, rows, columns) float -> (B, 1) float32 in (0, 1)."""
    B = x.shape[0]
    x_flat = x.reshape(B, -1)                       # torch.flatten(x, 1)
    in_features = x_flat.shape[1]
    assert in_features == packed_params[0][0].shape[1]

    tb = _pick_batch_tile(B, batch_tile)
    b_pad = _round_up(B, tb)
    grid = b_pad // tb

    # Single fused wrapper pass: cast to bf16, pad batch only, go feature-major.
    xb = x_flat.astype(jnp.bfloat16)
    if b_pad != B:
        xb = jnp.pad(xb, ((0, b_pad - B), (0, 0)))
    x_t = xb.T                                      # (in_features, b_pad) bf16

    flat_wb = []
    for w, b in packed_params:
        flat_wb.extend([w, b])

    flops = 2 * b_pad * sum(int(w.shape[0]) * int(w.shape[1])
                            for w, _ in packed_params)
    bytes_accessed = (int(x_t.size) * 2
                      + sum(int(w.size) * 2 + int(b.size) * 4
                            for w, b in packed_params)
                      + b_pad * 4)
    cost = pl.CostEstimate(flops=flops, transcendentals=b_pad,
                           bytes_accessed=bytes_accessed)

    def _resident_spec(shape, mode):
        # Weights / biases: one full-array block, VMEM-resident across the grid.
        if mode is None:
            return pl.BlockSpec(shape, lambda i: (0, 0))
        return pl.BlockSpec(shape, lambda i: (0, 0), pipeline_mode=mode)

    def _call(weight_mode):
        in_specs = [pl.BlockSpec((in_features, tb), lambda i: (0, i))]
        for w, b in packed_params:
            in_specs.append(_resident_spec(w.shape, weight_mode))
            in_specs.append(_resident_spec(b.shape, weight_mode))
        return pl.pallas_call(
            _discriminator_kernel,
            out_shape=jax.ShapeDtypeStruct((grid, 1, tb), jnp.float32),
            grid=(grid,),
            in_specs=in_specs,
            out_specs=pl.BlockSpec((1, 1, tb), lambda i: (i, 0, 0)),
            compiler_params=pltpu.CompilerParams(
                dimension_semantics=("parallel",)),
            cost_estimate=cost,
        )(x_t, *flat_wb)

    try:
        # Constant-index weights don't need double buffering (halves their VMEM
        # footprint; matters for scaled-up configs on v7x's 64 MiB VMEM).
        out = _call(pl.Buffered(1))
        jax.block_until_ready(out)
    except Exception:
        # Fallback if this jax build doesn't plumb pipeline_mode on TPU.
        out = _call(None)

    return out.reshape(b_pad, 1)[:B]


# ---------------------------------------------------------------------------
# Reference (same bf16-operand / f32-accumulate numerics, PyTorch weight layout)
# ---------------------------------------------------------------------------
def _reference_forward(x, params):
    h = x.reshape(x.shape[0], -1)
    for i, (w, b) in enumerate(params):
        y = jnp.dot(h.astype(jnp.bfloat16), w.T.astype(jnp.bfloat16),
                    preferred_element_type=jnp.float32) + b[None, :]
        h = jnp.maximum(y, LEAKY_SLOPE * y) if i < 4 else y
    return 1.0 / (1.0 + jnp.exp(-h))


if __name__ == "__main__":
    rows, columns = 8, 8      # in_features = 64 -> hidden 76, 64, 51, 32 -> 1

    key = jax.random.PRNGKey(0)
    key, kx = jax.random.split(key)
    params = init_discriminator_params(key, rows, columns)
    packed = pack_params(params)

    # Small-batch check (single grid step, full-array blocks).
    x_small = jax.random.normal(kx, (2, rows, columns), dtype=jnp.float32)
    out_small = jax.block_until_ready(
        ganeraid_discriminator_forward(x_small, packed))
    ref_small = _reference_forward(x_small, params)
    assert out_small.shape == (2, 1), out_small.shape
    assert jnp.allclose(out_small, ref_small, atol=1e-2, rtol=1e-2), (
        out_small, ref_small)

    # Multi-tile check (grid > 1: exercises the batch-sharded "parallel" path).
    key, kx2 = jax.random.split(key)
    x_big = jax.random.normal(kx2, (384, rows, columns), dtype=jnp.float32)
    out_big = jax.block_until_ready(
        ganeraid_discriminator_forward(x_big, packed))
    ref_big = _reference_forward(x_big, params)
    assert out_big.shape == (384, 1), out_big.shape
    assert jnp.allclose(out_big, ref_big, atol=1e-2, rtol=1e-2)

    print("KERNEL_OK")
</pallas_src>

<mosaic_0001>
module attributes {stable_mosaic.version = 11 : i64} {
  func.func @_discriminator_kernel(%arg0: i32, %arg1: memref<64x8xbf16, #tpu.memory_space<vmem>>, %arg2: memref<128x64xbf16, #tpu.memory_space<vmem>>, %arg3: memref<128x1xf32, #tpu.memory_space<vmem>>, %arg4: memref<128x128xbf16, #tpu.memory_space<vmem>>, %arg5: memref<128x1xf32, #tpu.memory_space<vmem>>, %arg6: memref<128x128xbf16, #tpu.memory_space<vmem>>, %arg7: memref<128x1xf32, #tpu.memory_space<vmem>>, %arg8: memref<128x128xbf16, #tpu.memory_space<vmem>>, %arg9: memref<128x1xf32, #tpu.memory_space<vmem>>, %arg10: memref<128x128xbf16, #tpu.memory_space<vmem>>, %arg11: memref<128x1xf32, #tpu.memory_space<vmem>>, %arg12: memref<1x1x8xf32, #tpu.memory_space<vmem>>) attributes {dimension_semantics = [#tpu.dimension_semantics<parallel>], iteration_bounds = array<i64: 1>, scalar_prefetch = 0 : i64, scratch_operands = 0 : i64, tpu.core_type = #tpu.core_type<tc>, window_params = [{transform_indices = @transform_0, window_bounds = array<i64: 64, 8>}, {pipeline_mode = #tpu.pipeline_mode<synchronous>, transform_indices = @transform_1, window_bounds = array<i64: 128, 64>}, {pipeline_mode = #tpu.pipeline_mode<synchronous>, transform_indices = @transform_2, window_bounds = array<i64: 128, 1>}, {pipeline_mode = #tpu.pipeline_mode<synchronous>, transform_indices = @transform_3, window_bounds = array<i64: 128, 128>}, {pipeline_mode = #tpu.pipeline_mode<synchronous>, transform_indices = @transform_4, window_bounds = array<i64: 128, 1>}, {pipeline_mode = #tpu.pipeline_mode<synchronous>, transform_indices = @transform_5, window_bounds = array<i64: 128, 128>}, {pipeline_mode = #tpu.pipeline_mode<synchronous>, transform_indices = @transform_6, window_bounds = array<i64: 128, 1>}, {pipeline_mode = #tpu.pipeline_mode<synchronous>, transform_indices = @transform_7, window_bounds = array<i64: 128, 128>}, {pipeline_mode = #tpu.pipeline_mode<synchronous>, transform_indices = @transform_8, window_bounds = array<i64: 128, 1>}, {pipeline_mode = #tpu.pipeline_mode<synchronous>, transform_indices = @transform_9, window_bounds = array<i64: 128, 128>}, {pipeline_mode = #tpu.pipeline_mode<synchronous>, transform_indices = @transform_10, window_bounds = array<i64: 128, 1>}, {transform_indices = @transform_11, window_bounds = array<i64: 1, 1, 8>}]} {
    %c0 = arith.constant 0 : index
    %c0_0 = arith.constant 0 : index
    %0 = vector.load %arg1[%c0, %c0_0] : memref<64x8xbf16, #tpu.memory_space<vmem>>, vector<64x8xbf16>
    %c0_1 = arith.constant 0 : index
    %c0_2 = arith.constant 0 : index
    %1 = vector.load %arg2[%c0_1, %c0_2] : memref<128x64xbf16, #tpu.memory_space<vmem>>, vector<128x64xbf16>
    %cst = arith.constant dense<0.000000e+00> : vector<128x8xf32>
    %2 = tpu.matmul %1, %0, %cst {dimension_numbers = #tpu.dot_dimension_numbers<[1], [0], [0], [1], [0, 0, 1, 1], [], []>} : vector<128x64xbf16>, vector<64x8xbf16>, vector<128x8xf32> -> vector<128x8xf32>
    %c0_3 = arith.constant 0 : index
    %c0_4 = arith.constant 0 : index
    %3 = vector.load %arg3[%c0_3, %c0_4] : memref<128x1xf32, #tpu.memory_space<vmem>>, vector<128x1xf32>
    %4 = vector.broadcast %3 : vector<128x1xf32> to vector<128x8xf32>
    %5 = arith.addf %2, %4 : vector<128x8xf32>
    %cst_5 = arith.constant 2.000000e-01 : f32
    %6 = vector.broadcast %cst_5 : f32 to vector<128x8xf32>
    %7 = arith.mulf %6, %5 : vector<128x8xf32>
    %8 = arith.maximumf %5, %7 : vector<128x8xf32>
    %c0_6 = arith.constant 0 : index
    %c0_7 = arith.constant 0 : index
    %9 = vector.load %arg4[%c0_6, %c0_7] : memref<128x128xbf16, #tpu.memory_space<vmem>>, vector<128x128xbf16>
    %10 = arith.truncf %8 : vector<128x8xf32> to vector<128x8xbf16>
    %cst_8 = arith.constant dense<0.000000e+00> : vector<128x8xf32>
    %11 = tpu.matmul %9, %10, %cst_8 {dimension_numbers = #tpu.dot_dimension_numbers<[1], [0], [0], [1], [0, 0, 1, 1], [], []>} : vector<128x128xbf16>, vector<128x8xbf16>, vector<128x8xf32> -> vector<128x8xf32>
    %c0_9 = arith.constant 0 : index
    %c0_10 = arith.constant 0 : index
    %12 = vector.load %arg5[%c0_9, %c0_10] : memref<128x1xf32, #tpu.memory_space<vmem>>, vector<128x1xf32>
    %13 = vector.broadcast %12 : vector<128x1xf32> to vector<128x8xf32>
    %14 = arith.addf %11, %13 : vector<128x8xf32>
    %cst_11 = arith.constant 2.000000e-01 : f32
    %15 = vector.broadcast %cst_11 : f32 to vector<128x8xf32>
    %16 = arith.mulf %15, %14 : vector<128x8xf32>
    %17 = arith.maximumf %14, %16 : vector<128x8xf32>
    %c0_12 = arith.constant 0 : index
    %c0_13 = arith.constant 0 : index
    %18 = vector.load %arg6[%c0_12, %c0_13] : memref<128x128xbf16, #tpu.memory_space<vmem>>, vector<128x128xbf16>
    %19 = arith.truncf %17 : vector<128x8xf32> to vector<128x8xbf16>
    %cst_14 = arith.constant dense<0.000000e+00> : vector<128x8xf32>
    %20 = tpu.matmul %18, %19, %cst_14 {dimension_numbers = #tpu.dot_dimension_numbers<[1], [0], [0], [1], [0, 0, 1, 1], [], []>} : vector<128x128xbf16>, vector<128x8xbf16>, vector<128x8xf32> -> vector<128x8xf32>
    %c0_15 = arith.constant 0 : index
    %c0_16 = arith.constant 0 : index
    %21 = vector.load %arg7[%c0_15, %c0_16] : memref<128x1xf32, #tpu.memory_space<vmem>>, vector<128x1xf32>
    %22 = vector.broadcast %21 : vector<128x1xf32> to vector<128x8xf32>
    %23 = arith.addf %20, %22 : vector<128x8xf32>
    %cst_17 = arith.constant 2.000000e-01 : f32
    %24 = vector.broadcast %cst_17 : f32 to vector<128x8xf32>
    %25 = arith.mulf %24, %23 : vector<128x8xf32>
    %26 = arith.maximumf %23, %25 : vector<128x8xf32>
    %c0_18 = arith.constant 0 : index
    %c0_19 = arith.constant 0 : index
    %27 = vector.load %arg8[%c0_18, %c0_19] : memref<128x128xbf16, #tpu.memory_space<vmem>>, vector<128x128xbf16>
    %28 = arith.truncf %26 : vector<128x8xf32> to vector<128x8xbf16>
    %cst_20 = arith.constant dense<0.000000e+00> : vector<128x8xf32>
    %29 = tpu.matmul %27, %28, %cst_20 {dimension_numbers = #tpu.dot_dimension_numbers<[1], [0], [0], [1], [0, 0, 1, 1], [], []>} : vector<128x128xbf16>, vector<128x8xbf16>, vector<128x8xf32> -> vector<128x8xf32>
    %c0_21 = arith.constant 0 : index
    %c0_22 = arith.constant 0 : index
    %30 = vector.load %arg9[%c0_21, %c0_22] : memref<128x1xf32, #tpu.memory_space<vmem>>, vector<128x1xf32>
    %31 = vector.broadcast %30 : vector<128x1xf32> to vector<128x8xf32>
    %32 = arith.addf %29, %31 : vector<128x8xf32>
    %cst_23 = arith.constant 2.000000e-01 : f32
    %33 = vector.broadcast %cst_23 : f32 to vector<128x8xf32>
    %34 = arith.mulf %33, %32 : vector<128x8xf32>
    %35 = arith.maximumf %32, %34 : vector<128x8xf32>
    %c0_24 = arith.constant 0 : index
    %c0_25 = arith.constant 0 : index
    %36 = vector.load %arg10[%c0_24, %c0_25] : memref<128x128xbf16, #tpu.memory_space<vmem>>, vector<128x128xbf16>
    %37 = arith.truncf %35 : vector<128x8xf32> to vector<128x8xbf16>
    %cst_26 = arith.constant dense<0.000000e+00> : vector<128x8xf32>
    %38 = tpu.matmul %36, %37, %cst_26 {dimension_numbers = #tpu.dot_dimension_numbers<[1], [0], [0], [1], [0, 0, 1, 1], [], []>} : vector<128x128xbf16>, vector<128x8xbf16>, vector<128x8xf32> -> vector<128x8xf32>
    %c0_27 = arith.constant 0 : index
    %c0_28 = arith.constant 0 : index
    %39 = vector.load %arg11[%c0_27, %c0_28] : memref<128x1xf32, #tpu.memory_space<vmem>>, vector<128x1xf32>
    %40 = vector.broadcast %39 : vector<128x1xf32> to vector<128x8xf32>
    %41 = arith.addf %38, %40 : vector<128x8xf32>
    %42 = vector.extract_strided_slice %41 {offsets = [0, 0], sizes = [1, 8], strides = [1, 1]} : vector<128x8xf32> to vector<1x8xf32>
    %cst_29 = arith.constant 0.000000e+00 : f32
    %43 = vector.broadcast %cst_29 : f32 to vector<1x8xf32>
    %44 = arith.subf %43, %42 : vector<1x8xf32>
    %45 = math.exp %44 : vector<1x8xf32>
    %cst_30 = arith.constant 1.000000e+00 : f32
    %46 = vector.broadcast %cst_30 : f32 to vector<1x8xf32>
    %47 = arith.addf %46, %45 : vector<1x8xf32>
    %cst_31 = arith.constant 1.000000e+00 : f32
    %48 = vector.broadcast %cst_31 : f32 to vector<1x8xf32>
    %49 = arith.divf %48, %47 : vector<1x8xf32>
    %c0_32 = arith.constant 0 : index
    %c0_33 = arith.constant 0 : index
    %c0_34 = arith.constant 0 : index
    %50 = vector.load %arg12[%c0_32, %c0_33, %c0_34] : memref<1x1x8xf32, #tpu.memory_space<vmem>>, vector<1x1x8xf32>
    %51 = vector.shape_cast %50 : vector<1x1x8xf32> to vector<1x8xf32>
    %52 = vector.shape_cast %49 : vector<1x8xf32> to vector<1x1x8xf32>
    tpu.vector_store %arg12[%c0_32, %c0_33, %c0_34], %52 {strides = array<i32>} : memref<1x1x8xf32, #tpu.memory_space<vmem>>, vector<1x1x8xf32>,
    return
  }
  func.func @transform_0(%arg0: i32) -> (i32, i32) {
    %c0_i32 = arith.constant 0 : i32
    %c0_i32_0 = arith.constant 0 : i32
    return %c0_i32, %arg0 : i32, i32
  }
  func.func @transform_1(%arg0: i32) -> (i32, i32) {
    %c0_i32 = arith.constant 0 : i32
    %c0_i32_0 = arith.constant 0 : i32
    %c0_i32_1 = arith.constant 0 : i32
    return %c0_i32, %c0_i32_0 : i32, i32
  }
  func.func @transform_2(%arg0: i32) -> (i32, i32) {
    %c0_i32 = arith.constant 0 : i32
    %c0_i32_0 = arith.constant 0 : i32
    %c0_i32_1 = arith.constant 0 : i32
    return %c0_i32, %c0_i32_0 : i32, i32
  }
  func.func @transform_3(%arg0: i32) -> (i32, i32) {
    %c0_i32 = arith.constant 0 : i32
    %c0_i32_0 = arith.constant 0 : i32
    %c0_i32_1 = arith.constant 0 : i32
    return %c0_i32, %c0_i32_0 : i32, i32
  }
  func.func @transform_4(%arg0: i32) -> (i32, i32) {
    %c0_i32 = arith.constant 0 : i32
    %c0_i32_0 = arith.constant 0 : i32
    %c0_i32_1 = arith.constant 0 : i32
    return %c0_i32, %c0_i32_0 : i32, i32
  }
  func.func @transform_5(%arg0: i32) -> (i32, i32) {
    %c0_i32 = arith.constant 0 : i32
    %c0_i32_0 = arith.constant 0 : i32
    %c0_i32_1 = arith.constant 0 : i32
    return %c0_i32, %c0_i32_0 : i32, i32
  }
  func.func @transform_6(%arg0: i32) -> (i32, i32) {
    %c0_i32 = arith.constant 0 : i32
    %c0_i32_0 = arith.constant 0 : i32
    %c0_i32_1 = arith.constant 0 : i32
    return %c0_i32, %c0_i32_0 : i32, i32
  }
  func.func @transform_7(%arg0: i32) -> (i32, i32) {
    %c0_i32 = arith.constant 0 : i32
    %c0_i32_0 = arith.constant 0 : i32
    %c0_i32_1 = arith.constant 0 : i32
    return %c0_i32, %c0_i32_0 : i32, i32
  }
  func.func @transform_8(%arg0: i32) -> (i32, i32) {
    %c0_i32 = arith.constant 0 : i32
    %c0_i32_0 = arith.constant 0 : i32
    %c0_i32_1 = arith.constant 0 : i32
    return %c0_i32, %c0_i32_0 : i32, i32
  }
  func.func @transform_9(%arg0: i32) -> (i32, i32) {
    %c0_i32 = arith.constant 0 : i32
    %c0_i32_0 = arith.constant 0 : i32
    %c0_i32_1 = arith.constant 0 : i32
    return %c0_i32, %c0_i32_0 : i32, i32
  }
  func.func @transform_10(%arg0: i32) -> (i32, i32) {
    %c0_i32 = arith.constant 0 : i32
    %c0_i32_0 = arith.constant 0 : i32
    %c0_i32_1 = arith.constant 0 : i32
    return %c0_i32, %c0_i32_0 : i32, i32
  }
  func.func @transform_11(%arg0: i32) -> (i32, i32, i32) {
    %c0_i32 = arith.constant 0 : i32
    %c0_i32_0 = arith.constant 0 : i32
    %c0_i32_1 = arith.constant 0 : i32
    return %arg0, %c0_i32, %c0_i32_0 : i32, i32, i32
  }
}

module attributes {stable_mosaic.version = 11 : i64} {
  func.func @_discriminator_kernel(%arg0: i32, %arg1: memref<64x8xbf16, #tpu.memory_space<vmem>>, %arg2: memref<128x64xbf16, #tpu.memory_space<vmem>>, %arg3: memref<128x1xf32, #tpu.memory_space<vmem>>, %arg4: memref<128x128xbf16, #tpu.memory_space<vmem>>, %arg5: memref<128x1xf32, #tpu.memory_space<vmem>>, %arg6: memref<128x128xbf16, #tpu.memory_space<vmem>>, %arg7: memref<128x1xf32, #tpu.memory_space<vmem>>, %arg8: memref<128x128xbf16, #tpu.memory_space<vmem>>, %arg9: memref<128x1xf32, #tpu.memory_space<vmem>>, %arg10: memref<128x128xbf16, #tpu.memory_space<vmem>>, %arg11: memref<128x1xf32, #tpu.memory_space<vmem>>, %arg12: memref<1x1x8xf32, #tpu.memory_space<vmem>>) attributes {dimension_semantics = [#tpu.dimension_semantics<parallel>], iteration_bounds = array<i64: 1>, scalar_prefetch = 0 : i64, scratch_operands = 0 : i64, tpu.core_type = #tpu.core_type<tc>, window_params = [{transform_indices = @transform_0, window_bounds = array<i64: 64, 8>}, {pipeline_mode = #tpu.pipeline_mode<synchronous>, transform_indices = @transform_1, window_bounds = array<i64: 128, 64>}, {pipeline_mode = #tpu.pipeline_mode<synchronous>, transform_indices = @transform_2, window_bounds = array<i64: 128, 1>}, {pipeline_mode = #tpu.pipeline_mode<synchronous>, transform_indices = @transform_3, window_bounds = array<i64: 128, 128>}, {pipeline_mode = #tpu.pipeline_mode<synchronous>, transform_indices = @transform_4, window_bounds = array<i64: 128, 1>}, {pipeline_mode = #tpu.pipeline_mode<synchronous>, transform_indices = @transform_5, window_bounds = array<i64: 128, 128>}, {pipeline_mode = #tpu.pipeline_mode<synchronous>, transform_indices = @transform_6, window_bounds = array<i64: 128, 1>}, {pipeline_mode = #tpu.pipeline_mode<synchronous>, transform_indices = @transform_7, window_bounds = array<i64: 128, 128>}, {pipeline_mode = #tpu.pipeline_mode<synchronous>, transform_indices = @transform_8, window_bounds = array<i64: 128, 1>}, {pipeline_mode = #tpu.pipeline_mode<synchronous>, transform_indices = @transform_9, window_bounds = array<i64: 128, 128>}, {pipeline_mode = #tpu.pipeline_mode<synchronous>, transform_indices = @transform_10, window_bounds = array<i64: 128, 1>}, {transform_indices = @transform_11, window_bounds = array<i64: 1, 1, 8>}]} {
    %c0 = arith.constant 0 : index
    %c0_0 = arith.constant 0 : index
    %0 = vector.load %arg1[%c0, %c0_0] : memref<64x8xbf16, #tpu.memory_space<vmem>>, vector<64x8xbf16>
    %c0_1 = arith.constant 0 : index
    %c0_2 = arith.constant 0 : index
    %1 = vector.load %arg2[%c0_1, %c0_2] : memref<128x64xbf16, #tpu.memory_space<vmem>>, vector<128x64xbf16>
    %cst = arith.constant dense<0.000000e+00> : vector<128x8xf32>
    %2 = tpu.matmul %1, %0, %cst {dimension_numbers = #tpu.dot_dimension_numbers<[1], [0], [0], [1], [0, 0, 1, 1], [], []>} : vector<128x64xbf16>, vector<64x8xbf16>, vector<128x8xf32> -> vector<128x8xf32>
    %c0_3 = arith.constant 0 : index
    %c0_4 = arith.constant 0 : index
    %3 = vector.load %arg3[%c0_3, %c0_4] : memref<128x1xf32, #tpu.memory_space<vmem>>, vector<128x1xf32>
    %4 = vector.broadcast %3 : vector<128x1xf32> to vector<128x8xf32>
    %5 = arith.addf %2, %4 : vector<128x8xf32>
    %cst_5 = arith.constant 2.000000e-01 : f32
    %6 = vector.broadcast %cst_5 : f32 to vector<128x8xf32>
    %7 = arith.mulf %6, %5 : vector<128x8xf32>
    %8 = arith.maximumf %5, %7 : vector<128x8xf32>
    %c0_6 = arith.constant 0 : index
    %c0_7 = arith.constant 0 : index
    %9 = vector.load %arg4[%c0_6, %c0_7] : memref<128x128xbf16, #tpu.memory_space<vmem>>, vector<128x128xbf16>
    %10 = arith.truncf %8 : vector<128x8xf32> to vector<128x8xbf16>
    %cst_8 = arith.constant dense<0.000000e+00> : vector<128x8xf32>
    %11 = tpu.matmul %9, %10, %cst_8 {dimension_numbers = #tpu.dot_dimension_numbers<[1], [0], [0], [1], [0, 0, 1, 1], [], []>} : vector<128x128xbf16>, vector<128x8xbf16>, vector<128x8xf32> -> vector<128x8xf32>
    %c0_9 = arith.constant 0 : index
    %c0_10 = arith.constant 0 : index
    %12 = vector.load %arg5[%c0_9, %c0_10] : memref<128x1xf32, #tpu.memory_space<vmem>>, vector<128x1xf32>
    %13 = vector.broadcast %12 : vector<128x1xf32> to vector<128x8xf32>
    %14 = arith.addf %11, %13 : vector<128x8xf32>
    %cst_11 = arith.constant 2.000000e-01 : f32
    %15 = vector.broadcast %cst_11 : f32 to vector<128x8xf32>
    %16 = arith.mulf %15, %14 : vector<128x8xf32>
    %17 = arith.maximumf %14, %16 : vector<128x8xf32>
    %c0_12 = arith.constant 0 : index
    %c0_13 = arith.constant 0 : index
    %18 = vector.load %arg6[%c0_12, %c0_13] : memref<128x128xbf16, #tpu.memory_space<vmem>>, vector<128x128xbf16>
    %19 = arith.truncf %17 : vector<128x8xf32> to vector<128x8xbf16>
    %cst_14 = arith.constant dense<0.000000e+00> : vector<128x8xf32>
    %20 = tpu.matmul %18, %19, %cst_14 {dimension_numbers = #tpu.dot_dimension_numbers<[1], [0], [0], [1], [0, 0, 1, 1], [], []>} : vector<128x128xbf16>, vector<128x8xbf16>, vector<128x8xf32> -> vector<128x8xf32>
    %c0_15 = arith.constant 0 : index
    %c0_16 = arith.constant 0 : index
    %21 = vector.load %arg7[%c0_15, %c0_16] : memref<128x1xf32, #tpu.memory_space<vmem>>, vector<128x1xf32>
    %22 = vector.broadcast %21 : vector<128x1xf32> to vector<128x8xf32>
    %23 = arith.addf %20, %22 : vector<128x8xf32>
    %cst_17 = arith.constant 2.000000e-01 : f32
    %24 = vector.broadcast %cst_17 : f32 to vector<128x8xf32>
    %25 = arith.mulf %24, %23 : vector<128x8xf32>
    %26 = arith.maximumf %23, %25 : vector<128x8xf32>
    %c0_18 = arith.constant 0 : index
    %c0_19 = arith.constant 0 : index
    %27 = vector.load %arg8[%c0_18, %c0_19] : memref<128x128xbf16, #tpu.memory_space<vmem>>, vector<128x128xbf16>
    %28 = arith.truncf %26 : vector<128x8xf32> to vector<128x8xbf16>
    %cst_20 = arith.constant dense<0.000000e+00> : vector<128x8xf32>
    %29 = tpu.matmul %27, %28, %cst_20 {dimension_numbers = #tpu.dot_dimension_numbers<[1], [0], [0], [1], [0, 0, 1, 1], [], []>} : vector<128x128xbf16>, vector<128x8xbf16>, vector<128x8xf32> -> vector<128x8xf32>
    %c0_21 = arith.constant 0 : index
    %c0_22 = arith.constant 0 : index
    %30 = vector.load %arg9[%c0_21, %c0_22] : memref<128x1xf32, #tpu.memory_space<vmem>>, vector<128x1xf32>
    %31 = vector.broadcast %30 : vector<128x1xf32> to vector<128x8xf32>
    %32 = arith.addf %29, %31 : vector<128x8xf32>
    %cst_23 = arith.constant 2.000000e-01 : f32
    %33 = vector.broadcast %cst_23 : f32 to vector<128x8xf32>
    %34 = arith.mulf %33, %32 : vector<128x8xf32>
    %35 = arith.maximumf %32, %34 : vector<128x8xf32>
    %c0_24 = arith.constant 0 : index
    %c0_25 = arith.constant 0 : index
    %36 = vector.load %arg10[%c0_24, %c0_25] : memref<128x128xbf16, #tpu.memory_space<vmem>>, vector<128x128xbf16>
    %37 = arith.truncf %35 : vector<128x8xf32> to vector<128x8xbf16>
    %cst_26 = arith.constant dense<0.000000e+00> : vector<128x8xf32>
    %38 = tpu.matmul %36, %37, %cst_26 {dimension_numbers = #tpu.dot_dimension_numbers<[1], [0], [0], [1], [0, 0, 1, 1], [], []>} : vector<128x128xbf16>, vector<128x8xbf16>, vector<128x8xf32> -> vector<128x8xf32>
    %c0_27 = arith.constant 0 : index
    %c0_28 = arith.constant 0 : index
    %39 = vector.load %arg11[%c0_27, %c0_28] : memref<128x1xf32, #tpu.memory_space<vmem>>, vector<128x1xf32>
    %40 = vector.broadcast %39 : vector<128x1xf32> to vector<128x8xf32>
    %41 = arith.addf %38, %40 : vector<128x8xf32>
    %42 = vector.extract_strided_slice %41 {offsets = [0, 0], sizes = [1, 8], strides = [1, 1]} : vector<128x8xf32> to vector<1x8xf32>
    %cst_29 = arith.constant 0.000000e+00 : f32
    %43 = vector.broadcast %cst_29 : f32 to vector<1x8xf32>
    %44 = arith.subf %43, %42 : vector<1x8xf32>
    %45 = math.exp %44 : vector<1x8xf32>
    %cst_30 = arith.constant 1.000000e+00 : f32
    %46 = vector.broadcast %cst_30 : f32 to vector<1x8xf32>
    %47 = arith.addf %46, %45 : vector<1x8xf32>
    %cst_31 = arith.constant 1.000000e+00 : f32
    %48 = vector.broadcast %cst_31 : f32 to vector<1x8xf32>
    %49 = arith.divf %48, %47 : vector<1x8xf32>
    %c0_32 = arith.constant 0 : index
    %c0_33 = arith.constant 0 : index
    %c0_34 = arith.constant 0 : index
    %50 = vector.load %arg12[%c0_32, %c0_33, %c0_34] : memref<1x1x8xf32, #tpu.memory_space<vmem>>, vector<1x1x8xf32>
    %51 = vector.shape_cast %50 : vector<1x1x8xf32> to vector<1x8xf32>
    %52 = vector.shape_cast %49 : vector<1x8xf32> to vector<1x1x8xf32>
    tpu.vector_store %arg12[%c0_32, %c0_33, %c0_34], %52 {strides = array<i32>} : memref<1x1x8xf32, #tpu.memory_space<vmem>>, vector<1x1x8xf32>,
    return
  }
  func.func @transform_0(%arg0: i32) -> (i32, i32) {
    %c0_i32 = arith.constant 0 : i32
    %c0_i32_0 = arith.constant 0 : i32
    return %c0_i32, %arg0 : i32, i32
  }
  func.func @transform_1(%arg0: i32) -> (i32, i32) {
    %c0_i32 = arith.constant 0 : i32
    %c0_i32_0 = arith.constant 0 : i32
    %c0_i32_1 = arith.constant 0 : i32
    return %c0_i32, %c0_i32_0 : i32, i32
  }
  func.func @transform_2(%arg0: i32) -> (i32, i32) {
    %c0_i32 = arith.constant 0 : i32
    %c0_i32_0 = arith.constant 0 : i32
    %c0_i32_1 = arith.constant 0 : i32
    return %c0_i32, %c0_i32_0 : i32, i32
  }
  func.func @transform_3(%arg0: i32) -> (i32, i32) {
    %c0_i32 = arith.constant 0 : i32
    %c0_i32_0 = arith.constant 0 : i32
    %c0_i32_1 = arith.constant 0 : i32
    return %c0_i32, %c0_i32_0 : i32, i32
  }
  func.func @transform_4(%arg0: i32) -> (i32, i32) {
    %c0_i32 = arith.constant 0 : i32
    %c0_i32_0 = arith.constant 0 : i32
    %c0_i32_1 = arith.constant 0 : i32
    return %c0_i32, %c0_i32_0 : i32, i32
  }
  func.func @transform_5(%arg0: i32) -> (i32, i32) {
    %c0_i32 = arith.constant 0 : i32
    %c0_i32_0 = arith.constant 0 : i32
    %c0_i32_1 = arith.constant 0 : i32
    return %c0_i32, %c0_i32_0 : i32, i32
  }
  func.func @transform_6(%arg0: i32) -> (i32, i32) {
    %c0_i32 = arith.constant 0 : i32
    %c0_i32_0 = arith.constant 0 : i32
    %c0_i32_1 = arith.constant 0 : i32
    return %c0_i32, %c0_i32_0 : i32, i32
  }
  func.func @transform_7(%arg0: i32) -> (i32, i32) {
    %c0_i32 = arith.constant 0 : i32
    %c0_i32_0 = arith.constant 0 : i32
    %c0_i32_1 = arith.constant 0 : i32
    return %c0_i32, %c0_i32_0 : i32, i32
  }
  func.func @transform_8(%arg0: i32) -> (i32, i32) {
    %c0_i32 = arith.constant 0 : i32
    %c0_i32_0 = arith.constant 0 : i32
    %c0_i32_1 = arith.constant 0 : i32
    return %c0_i32, %c0_i32_0 : i32, i32
  }
  func.func @transform_9(%arg0: i32) -> (i32, i32) {
    %c0_i32 = arith.constant 0 : i32
    %c0_i32_0 = arith.constant 0 : i32
    %c0_i32_1 = arith.constant 0 : i32
    return %c0_i32, %c0_i32_0 : i32, i32
  }
  func.func @transform_10(%arg0: i32) -> (i32, i32) {
    %c0_i32 = arith.constant 0 : i32
    %c0_i32_0 = arith.constant 0 : i32
    %c0_i32_1 = arith.constant 0 : i32
    return %c0_i32, %c0_i32_0 : i32, i32
  }
  func.func @transform_11(%arg0: i32) -> (i32, i32, i32) {
    %c0_i32 = arith.constant 0 : i32
    %c0_i32_0 = arith.constant 0 : i32
    %c0_i32_1 = arith.constant 0 : i32
    return %arg0, %c0_i32, %c0_i32_0 : i32, i32, i32
  }
}

</mosaic_0001>

<bundles_post_ra>
// kernel: tpu_custom_call.1
= control target key start
LH: loop header
LB: loop body
LE: loop exit
PB: predicated region body
PF: predicated region fallthrough
CT: control target
= control target key end

     0   :  { %v1898_v2 = vmov 0   ;;  %vm224_vm0 = vcmask 523264   ;;  %s2307_s0 = inlined_call_operand.vmem [shape: bf16[64,8], index: 0, kind: input, shape index: {}]   ;;  %s2308_s1 = inlined_call_operand.vmem [shape: bf16[128,64], index: 1, kind: input, shape index: {}]   ;;  %s2309_s2 = inlined_call_operand.vmem [shape: f32[128,1], index: 2, kind: input, shape index: {}]   ;;  %s2310_s3 = inlined_call_operand.vmem [shape: bf16[128,128], index: 3, kind: input, shape index: {}]   ;;  %s2311_s4 = inlined_call_operand.vmem [shape: f32[128,1], index: 4, kind: input, shape index: {}]   ;;  %s2312_s5 = inlined_call_operand.vmem [shape: bf16[128,128], index: 5, kind: input, shape index: {}]   ;;  %s2313_s6 = inlined_call_operand.vmem [shape: f32[128,1], index: 6, kind: input, shape index: {}]   ;;  %s2314_s7 = inlined_call_operand.vmem [shape: bf16[128,128], index: 7, kind: input, shape index: {}]   ;;  %s2315_s8 = inlined_call_operand.vmem [shape: f32[128,1], index: 8, kind: input, shape index: {}]   ;;  %s2316_s9 = inlined_call_operand.vmem [shape: bf16[128,128], index: 9, kind: input, shape index: {}]   ;;  %s2317_s10 = inlined_call_operand.vmem [shape: f32[128,1], index: 10, kind: input, shape index: {}]   ;;  %s2318_s11 = inlined_call_operand.hbm [shape: f32[1,1,8], index: 11, kind: output, shape index: {}]  }
   0x1   :  { %v66_v0 = vld [vmem:[%s2309_s2 + $0x10] sm:$0xff]  ;;  %v64_v1 = vld [vmem:[%s2309_s2] sm:$0xff]  ;;  %1825 = vset.pattern.permute.xlu1 %v1898_v2  ;;  %1824 = vset.pattern.permute.xlu0 %v1898_v2  ;;  %v67_v4 = vld [vmem:[%s2309_s2 + $0x18] sm:$0xff] }
   0x2   :  { %v1826_v3 = vld [vmem:[%s2307_s0] sm:$0xff]   ;;  %92 = vperm.xlu1 %1825, %v66_v0   ;;  %82 = vperm.xlu0 %1824, %v64_v1   ;;  %v65_v5 = vld [vmem:[%s2309_s2 + $0x8] sm:$0xff]  ;;  %v1828_v7 = vld [vmem:[%s2307_s0 + $0x10] sm:$0xff]  }
   0x3   :  { %1654 = vmatprep.subr.bf16.mxu0 %v1826_v3  ;;  %v1827_v6 = vld [vmem:[%s2307_s0 + $0x8] sm:$0xff]   ;;  %v68_v9 = vld [vmem:[%s2309_s2 + $0x20] sm:$0xff]  ;;  %v1829_v11 = vld [vmem:[%s2307_s0 + $0x18] sm:$0xff]  }
   0x4   :  { %1655 = vmatpush3.bf16.msra.mxu0 %v1826_v3  ;;  %v69_v8 = vld [vmem:[%s2309_s2 + $0x28] sm:$0xff]  ;;  %v1830_v10 = vld [vmem:[%s2308_s1] sm:$0xff]   ;;  %v71_v12 = vld [vmem:[%s2309_s2 + $0x38] sm:$0xff] }
   0x5   :  { %1656 = vmatprep.subr.bf16.mxu0 %v1827_v6  ;;  %v70_v13 = vld [vmem:[%s2309_s2 + $0x30] sm:$0xff]  ;;  %1662 = vmatprep.mubr.msk.bf16.mxu0 %vm224_vm0, %v1830_v10  ;;  %v73_v14 = vld [vmem:[%s2309_s2 + $0x48] sm:$0xff]  ;;  %v72_v15 = vld [vmem:[%s2309_s2 + $0x40] sm:$0xff] }
   0x6   :  { %97 = vperm.xlu1 %1825, %v67_v4   ;;  %87 = vperm.xlu0 %1824, %v65_v5   ;;  %v1831_v16 = vld [vmem:[%s2308_s1 + $0x8] sm:$0xff]   ;;  %v1832_v17 = vld [vmem:[%s2308_s1 + $0x10] sm:$0xff]   ;;  %v75_v18 = vld [vmem:[%s2309_s2 + $0x58] sm:$0xff] }
   0x7   :  { %v74_v19 = vld [vmem:[%s2309_s2 + $0x50] sm:$0xff]  ;;  %v77_v20 = vld [vmem:[%s2309_s2 + $0x68] sm:$0xff]  ;;  %v76_v21 = vld [vmem:[%s2309_s2 + $0x60] sm:$0xff] }
   0x8   :  { %1657 = vmatpush3.bf16.msra.mxu0 %v1827_v6  ;;  %v1833_v22 = vld [vmem:[%s2308_s1 + $0x18] sm:$0xff]   ;;  %v1834_v23 = vld [vmem:[%s2308_s1 + $0x20] sm:$0xff]   ;;  %v78_v25 = vld [vmem:[%s2309_s2 + $0x70] sm:$0xff] }
   0x9   :  { %1658 = vmatprep.subr.bf16.mxu0 %v1828_v7  ;;  %v79_v24 = vld [vmem:[%s2309_s2 + $0x78] sm:$0xff]  ;;  %v403_v26 = vld [vmem:[%s2311_s4 + $0x8] sm:$0xff]  ;;  %v402_v27 = vld [vmem:[%s2311_s4] sm:$0xff] }
   0xa   :  { %107 = vperm.xlu1 %1825, %v69_v8   ;;  %102 = vperm.xlu0 %1824, %v68_v9   ;;  %v1835_v28 = vld [vmem:[%s2308_s1 + $0x28] sm:$0xff]   ;;  %v1836_v29 = vld [vmem:[%s2308_s1 + $0x30] sm:$0xff]   ;;  %v405_v30 = vld [vmem:[%s2311_s4 + $0x18] sm:$0xff] }
   0xb   :  { %v404_v31 = vld [vmem:[%s2311_s4 + $0x10] sm:$0xff]  ;;  %v407_v32 = vld [vmem:[%s2311_s4 + $0x28] sm:$0xff]  ;;  %v406_v33 = vld [vmem:[%s2311_s4 + $0x20] sm:$0xff] }
   0xc   :  { %1659 = vmatpush3.bf16.msra.mxu0 %v1828_v7  ;;  %v1837_v34 = vld [vmem:[%s2308_s1 + $0x38] sm:$0xff]   ;;  %v408_v36 = vld [vmem:[%s2311_s4 + $0x30] sm:$0xff]  ;;  %v411_v37 = vld [vmem:[%s2311_s4 + $0x48] sm:$0xff] }
   0xd   :  { %1660 = vmatprep.subr.bf16.mxu0 %v1829_v11  ;;  %v409_v35 = vld [vmem:[%s2311_s4 + $0x38] sm:$0xff]  ;;  %v410_v38 = vld [vmem:[%s2311_s4 + $0x40] sm:$0xff]  ;;  %v412_v40 = vld [vmem:[%s2311_s4 + $0x50] sm:$0xff] }
   0xe   :  { %117 = vperm.xlu1 %1825, %v71_v12   ;;  %112 = vperm.xlu0 %1824, %v70_v13   ;;  %v413_v39 = vld [vmem:[%s2311_s4 + $0x58] sm:$0xff]  ;;  %v415_v41 = vld [vmem:[%s2311_s4 + $0x68] sm:$0xff]  ;;  %v414_v42 = vld [vmem:[%s2311_s4 + $0x60] sm:$0xff] }
  0x10   :  { %1661 = vmatpush3.bf16.msra.mxu0 %v1829_v11 }
  0x12   :  { %127 = vperm.xlu1 %1825, %v73_v14   ;;  %122 = vperm.xlu0 %1824, %v72_v15  }
  0x13   :  { %1663 = vmatmul.mubr.msk.bf16.vlgmr.msra.gmra.mrb[0].mxu0 %vm224_vm0, %v1831_v16 }
  0x14   :  { %1666 = vmatprep.mubr.msk.bf16.mxu0 %vm224_vm0, %v1832_v17 }
  0x16   :  { %137 = vperm.xlu1 %1825, %v75_v18   ;;  %132 = vperm.xlu0 %1824, %v74_v19  }
  0x1a   :  { %147 = vperm.xlu1 %1825, %v77_v20   ;;  %142 = vperm.xlu0 %1824, %v76_v21  }
  0x1b   :  { %1667 = vmatmul.mubr.msk.bf16.gmra.mrb[4].mxu0 %vm224_vm0, %v1833_v22 }
  0x1c   :  { %1670 = vmatprep.mubr.msk.bf16.mxu0 %vm224_vm0, %v1834_v23 }
  0x1e   :  { %157 = vperm.xlu1 %1825, %v79_v24   ;;  %152 = vperm.xlu0 %1824, %v78_v25  }
  0x22   :  { %425 = vperm.xlu1 %1825, %v403_v26   ;;  %420 = vperm.xlu0 %1824, %v402_v27  }
  0x23   :  { %1671 = vmatmul.mubr.msk.bf16.gmra.mrb[8].mxu0 %vm224_vm0, %v1835_v28 }
  0x24   :  { %1674 = vmatprep.mubr.msk.bf16.mxu0 %vm224_vm0, %v1836_v29 }
  0x26   :  { %435 = vperm.xlu1 %1825, %v405_v30   ;;  %430 = vperm.xlu0 %1824, %v404_v31  }
  0x2a   :  { %445 = vperm.xlu1 %1825, %v407_v32   ;;  %440 = vperm.xlu0 %1824, %v406_v33  }
  0x2b   :  { %1675 = vmatmul.mubr.msk.bf16.gmra.mrb[12].mxu0 %vm224_vm0, %v1837_v34 }
  0x2e   :  { %455 = vperm.xlu1 %1825, %v409_v35   ;;  %450 = vperm.xlu0 %1824, %v408_v36  }
  0x32   :  { %465 = vperm.xlu1 %1825, %v411_v37   ;;  %460 = vperm.xlu0 %1824, %v410_v38  }
  0x36   :  { %475 = vperm.xlu1 %1825, %v413_v39   ;;  %470 = vperm.xlu0 %1824, %v412_v40  }
  0x37   :  { %16 = vsyncpa [#allocation3], 0  ;;  %v417_v43 = vld [vmem:[%s2311_s4 + $0x78] sm:$0xff]  ;;  %v416_v44 = vld [vmem:[%s2311_s4 + $0x70] sm:$0xff]  ;;  %vm1510_vm1 = vcmask 57344  }
  0x38   :  { %v700_v45 = vld [vmem:[%s2313_s6 + $0x8] sm:$0xff]  ;;  %v699_v46 = vld [vmem:[%s2313_s6] sm:$0xff]  ;;  %v702_v47 = vld [vmem:[%s2313_s6 + $0x18] sm:$0xff] }
  0x39   :  { %v701_v48 = vld [vmem:[%s2313_s6 + $0x10] sm:$0xff]  ;;  %v704_v49 = vld [vmem:[%s2313_s6 + $0x28] sm:$0xff]  ;;  %v703_v50 = vld [vmem:[%s2313_s6 + $0x20] sm:$0xff] }
  0x3a   :  { %485 = vperm.xlu1 %1825, %v415_v41   ;;  %480 = vperm.xlu0 %1824, %v414_v42   ;;  %v706_v51 = vld [vmem:[%s2313_s6 + $0x38] sm:$0xff]  ;;  %v705_v52 = vld [vmem:[%s2313_s6 + $0x30] sm:$0xff]  ;;  %v708_v53 = vld [vmem:[%s2313_s6 + $0x48] sm:$0xff] }
  0x3b   :  { %v707_v54 = vld [vmem:[%s2313_s6 + $0x40] sm:$0xff]  ;;  %v710_v55 = vld [vmem:[%s2313_s6 + $0x58] sm:$0xff]  ;;  %v709_v56 = vld [vmem:[%s2313_s6 + $0x50] sm:$0xff] }
  0x3c   :  { %v712_v57 = vld [vmem:[%s2313_s6 + $0x68] sm:$0xff]  ;;  %v711_v58 = vld [vmem:[%s2313_s6 + $0x60] sm:$0xff]  ;;  %v714_v59 = vld [vmem:[%s2313_s6 + $0x78] sm:$0xff] }
  0x3d   :  { %v713_v60 = vld [vmem:[%s2313_s6 + $0x70] sm:$0xff]  ;;  %v997_v61 = vld [vmem:[%s2315_s8 + $0x8] sm:$0xff]  ;;  %v996_v62 = vld [vmem:[%s2315_s8] sm:$0xff] }
  0x3e   :  { %495 = vperm.xlu1 %1825, %v417_v43   ;;  %490 = vperm.xlu0 %1824, %v416_v44   ;;  %v999_v63 = vld [vmem:[%s2315_s8 + $0x18] sm:$0xff]  ;;  %v998_v0 = vld [vmem:[%s2315_s8 + $0x10] sm:$0xff]  ;;  %v1001_v1 = vld [vmem:[%s2315_s8 + $0x28] sm:$0xff] }
  0x3f   :  { %v1000_v2 = vld [vmem:[%s2315_s8 + $0x20] sm:$0xff]  ;;  %v1003_v3 = vld [vmem:[%s2315_s8 + $0x38] sm:$0xff]  ;;  %v1002_v4 = vld [vmem:[%s2315_s8 + $0x30] sm:$0xff] }
  0x40   :  { %v1005_v5 = vld [vmem:[%s2315_s8 + $0x48] sm:$0xff]  ;;  %v1004_v6 = vld [vmem:[%s2315_s8 + $0x40] sm:$0xff]  ;;  %v1007_v7 = vld [vmem:[%s2315_s8 + $0x58] sm:$0xff] }
  0x41   :  { %v1006_v8 = vld [vmem:[%s2315_s8 + $0x50] sm:$0xff]  ;;  %v1009_v9 = vld [vmem:[%s2315_s8 + $0x68] sm:$0xff]  ;;  %v1008_v10 = vld [vmem:[%s2315_s8 + $0x60] sm:$0xff] }
  0x42   :  { %722 = vperm.xlu1 %1825, %v700_v45   ;;  %717 = vperm.xlu0 %1824, %v699_v46   ;;  %v1011_v11 = vld [vmem:[%s2315_s8 + $0x78] sm:$0xff]  ;;  %v1010_v12 = vld [vmem:[%s2315_s8 + $0x70] sm:$0xff]  ;;  %v1293_v13 = vld [vmem:[%s2317_s10] sm:$0xff] }
  0x43   :  { %v1838_v14 = vld [vmem:[%s2310_s3] sm:$0xff]  }
  0x44   :  { %1694 = vmatprep.mubr.bf16.mxu1 %v1838_v14 }
  0x46   :  { %732 = vperm.xlu1 %1825, %v702_v47   ;;  %727 = vperm.xlu0 %1824, %v701_v48  }
  0x4a   :  { %742 = vperm.xlu1 %1825, %v704_v49   ;;  %737 = vperm.xlu0 %1824, %v703_v50  }
  0x4e   :  { %752 = vperm.xlu1 %1825, %v706_v51   ;;  %747 = vperm.xlu0 %1824, %v705_v52  }
  0x52   :  { %762 = vperm.xlu1 %1825, %v708_v53   ;;  %757 = vperm.xlu0 %1824, %v707_v54  }
  0x56   :  { %772 = vperm.xlu1 %1825, %v710_v55   ;;  %767 = vperm.xlu0 %1824, %v709_v56  }
  0x5a   :  { %782 = vperm.xlu1 %1825, %v712_v57   ;;  %777 = vperm.xlu0 %1824, %v711_v58  }
  0x5e   :  { %792 = vperm.xlu1 %1825, %v714_v59   ;;  %787 = vperm.xlu0 %1824, %v713_v60  }
  0x62   :  { %1019 = vperm.xlu1 %1825, %v997_v61   ;;  %1014 = vperm.xlu0 %1824, %v996_v62  }
  0x66   :  { %1029 = vperm.xlu1 %1825, %v999_v63   ;;  %1024 = vperm.xlu0 %1824, %v998_v0  }
  0x6a   :  { %1039 = vperm.xlu1 %1825, %v1001_v1   ;;  %1034 = vperm.xlu0 %1824, %v1000_v2  }
  0x6e   :  { %1049 = vperm.xlu1 %1825, %v1003_v3   ;;  %1044 = vperm.xlu0 %1824, %v1002_v4  }
  0x72   :  { %1059 = vperm.xlu1 %1825, %v1005_v5   ;;  %1054 = vperm.xlu0 %1824, %v1004_v6  }
  0x76   :  { %1069 = vperm.xlu1 %1825, %v1007_v7   ;;  %1064 = vperm.xlu0 %1824, %v1006_v8  }
  0x7a   :  { %1079 = vperm.xlu1 %1825, %v1009_v9   ;;  %1074 = vperm.xlu0 %1824, %v1008_v10  }
  0x7e   :  { %1089 = vperm.xlu1 %1825, %v1011_v11   ;;  %1084 = vperm.xlu0 %1824, %v1010_v12  }
  0x81   :  { %v83_v15 = vpop.permute.xlu0 %82  ;;  %v93_v16 = vpop.permute.xlu1 %92 }
  0x82   :  { %1311 = vperm.xlu0 %1824, %v1293_v13  }
  0x85   :  { %v88_v17 = vpop.permute.xlu0 %87  ;;  %v98_v18 = vpop.permute.xlu1 %97 }
  0x89   :  { %v103_v19 = vpop.permute.xlu0 %102  ;;  %v108_v20 = vpop.permute.xlu1 %107 }
  0x8d   :  { %v113_v21 = vpop.permute.xlu0 %112  ;;  %v118_v25 = vpop.permute.xlu1 %117 }
  0x91   :  { %v123_v34 = vpop.permute.xlu0 %122  ;;  %v128_v38 = vpop.permute.xlu1 %127 }
  0x95   :  { %v133_v50 = vpop.permute.xlu0 %132  ;;  %v138_v55 = vpop.permute.xlu1 %137 }
  0x99   :  { %v143_v1 = vpop.permute.xlu0 %142  ;;  %v148_v7 = vpop.permute.xlu1 %147 }
  0xe6   :  { %v1664_v22 = vpop.f32.mrb[0].mxu0 }
  0xe7   :  { %v292_v23 = vadd.f32 %v1664_v22, %v93_v16  ;;  %v283_v24 = vpop.f32.mrb[1].mxu0  ;;  %v158_v22 = vpop.permute.xlu1 %157 }
  0xe8   :  { %v284_v26 = vadd.f32 %v283_v24, %v83_v15  ;;  %v1665_v27 = vpop.f32.mrb[2].mxu0  ;;  %v153_v15 = vpop.permute.xlu0 %152 }
  0xe9   :  { %v348_v28 = vmul.f32 0.2, %v292_v23  ;;  %v295_v29 = vadd.f32 %v1665_v27, %v98_v18  ;;  %v286_v30 = vpop.f32.mrb[3].mxu0 }
  0xea   :  { %v346_v31 = vmul.f32 0.2, %v284_v26  ;;  %v287_v33 = vadd.f32 %v286_v30, %v88_v17 }
  0xeb   :  { %v349_v32 = vmul.f32 0.2, %v295_v29  ;;  %v364_v35 = vmax.f32 %v292_v23, %v348_v28 }
  0xec   :  { %v347_v37 = vmul.f32 0.2, %v287_v33  ;;  %v362_v40 = vmax.f32 %v284_v26, %v346_v31 }
  0xed   :  { %v365_v36 = vmax.f32 %v295_v29, %v349_v32 }
  0xee   :  { %v1668_v39 = vpop.f32.mrb[4].mxu0  ;;  %v363_v41 = vmax.f32 %v287_v33, %v347_v37 }
  0xef   :  { %v308_v42 = vadd.f32 %v1668_v39, %v113_v21  ;;  %v299_v43 = vpop.f32.mrb[5].mxu0  ;;  %v395_v44 = vpack.c.bf16 %v365_v36, %v364_v35  ;;  %v1839_v39 = vld [vmem:[%s2310_s3 + $0x8] sm:$0xff]  }
  0xf0   :  { %v300_v45 = vadd.f32 %v299_v43, %v103_v19  ;;  %v1669_v46 = vpop.f32.mrb[6].mxu0  ;;  %v394_v49 = vpack.c.bf16 %v363_v41, %v362_v40  ;;  %v1840_v40 = vld [vmem:[%s2310_s3 + $0x10] sm:$0xff]   ;;  %v1841_v41 = vld [vmem:[%s2310_s3 + $0x18] sm:$0xff]   ;;  %v1843_v43 = vld [vmem:[%s2310_s3 + $0x28] sm:$0xff]  }
  0xf1   :  { %v352_v47 = vmul.f32 0.2, %v308_v42  ;;  %v311_v48 = vadd.f32 %v1669_v46, %v118_v25  ;;  %v302_v51 = vpop.f32.mrb[7].mxu0  ;;  %v1846_v46 = vld [vmem:[%s2312_s5] sm:$0xff]  }
  0xf2   :  { %v350_v52 = vmul.f32 0.2, %v300_v45  ;;  %v303_v54 = vadd.f32 %v302_v51, %v108_v20  ;;  %1678 = vmatprep.subr.bf16.mxu1 %v394_v49  ;;  %1726 = vmatprep.mubr.bf16.mxu0 %v1846_v46 }
  0xf3   :  { %v353_v53 = vmul.f32 0.2, %v311_v48  ;;  %1679 = vmatpush3.bf16.msra.mxu1 %v394_v49  ;;  %v368_v56 = vmax.f32 %v308_v42, %v352_v47  ;;  %v1842_v42 = vld [vmem:[%s2310_s3 + $0x20] sm:$0xff]   ;;  %v421_v47 = vpop.permute.xlu0 %420 }
  0xf4   :  { %v351_v58 = vmul.f32 0.2, %v303_v54  ;;  %1680 = vmatprep.subr.bf16.mxu1 %v395_v44  ;;  %v366_v60 = vmax.f32 %v300_v45, %v350_v52  ;;  %v1845_v45 = vld [vmem:[%s2310_s3 + $0x38] sm:$0xff]  }
  0xf5   :  { %v369_v57 = vmax.f32 %v311_v48, %v353_v53  ;;  %v426_v48 = vpop.permute.xlu1 %425 }
  0xf6   :  { %v1672_v59 = vpop.f32.mrb[8].mxu0  ;;  %v367_v61 = vmax.f32 %v303_v54, %v351_v58 }
  0xf7   :  { %v324_v62 = vadd.f32 %v1672_v59, %v133_v50  ;;  %v315_v63 = vpop.f32.mrb[9].mxu0  ;;  %v397_v0 = vpack.c.bf16 %v369_v57, %v368_v56  ;;  %1681 = vmatpush3.bf16.msra.mxu1 %v395_v44  ;;  %v1844_v44 = vld [vmem:[%s2310_s3 + $0x30] sm:$0xff]   ;;  %v431_v49 = vpop.permute.xlu0 %430 }
  0xf8   :  { %v316_v2 = vadd.f32 %v315_v63, %v123_v34  ;;  %v1673_v3 = vpop.f32.mrb[10].mxu0  ;;  %v396_v6 = vpack.c.bf16 %v367_v61, %v366_v60 }
  0xf9   :  { %v356_v4 = vmul.f32 0.2, %v324_v62  ;;  %v327_v5 = vadd.f32 %v1673_v3, %v138_v55  ;;  %v318_v8 = vpop.f32.mrb[11].mxu0  ;;  %v436_v50 = vpop.permute.xlu1 %435 }
  0xfa   :  { %v354_v9 = vmul.f32 0.2, %v316_v2  ;;  %v319_v11 = vadd.f32 %v318_v8, %v128_v38  ;;  %1682 = vmatprep.subr.bf16.mxu1 %v396_v6 }
  0xfb   :  { %v357_v10 = vmul.f32 0.2, %v327_v5  ;;  %1683 = vmatpush3.bf16.msra.mxu1 %v396_v6  ;;  %v372_v12 = vmax.f32 %v324_v62, %v356_v4  ;;  %v441_v51 = vpop.permute.xlu0 %440 }
  0xfc   :  { %v355_v14 = vmul.f32 0.2, %v319_v11  ;;  %1684 = vmatprep.subr.bf16.mxu1 %v397_v0  ;;  %v370_v17 = vmax.f32 %v316_v2, %v354_v9 }
  0xfd   :  { %v373_v13 = vmax.f32 %v327_v5, %v357_v10  ;;  %v446_v52 = vpop.permute.xlu1 %445 }
  0xfe   :  { %v1676_v16 = vpop.f32.mrb[12].mxu0  ;;  %v371_v18 = vmax.f32 %v319_v11, %v355_v14 }
  0xff   :  { %v340_v19 = vadd.f32 %v1676_v16, %v153_v15  ;;  %v331_v20 = vpop.f32.mrb[13].mxu0  ;;  %v399_v21 = vpack.c.bf16 %v373_v13, %v372_v12  ;;  %1685 = vmatpush3.bf16.msra.mxu1 %v397_v0  ;;  %v451_v53 = vpop.permute.xlu0 %450 }
 0x100   :  { %v332_v23 = vadd.f32 %v331_v20, %v143_v1  ;;  %v1677_v24 = vpop.f32.mrb[14].mxu0  ;;  %v398_v28 = vpack.c.bf16 %v371_v18, %v370_v17 }
 0x101   :  { %v360_v25 = vmul.f32 0.2, %v340_v19  ;;  %v343_v26 = vadd.f32 %v1677_v24, %v158_v22  ;;  %v334_v27 = vpop.f32.mrb[15].mxu0  ;;  %v456_v57 = vpop.permute.xlu1 %455 }
 0x102   :  { %v358_v29 = vmul.f32 0.2, %v332_v23  ;;  %v335_v30 = vadd.f32 %v334_v27, %v148_v7  ;;  %1686 = vmatprep.subr.bf16.mxu1 %v398_v28 }
 0x103   :  { %v361_v31 = vmul.f32 0.2, %v343_v26  ;;  %1687 = vmatpush3.bf16.msra.mxu1 %v398_v28  ;;  %v376_v33 = vmax.f32 %v340_v19, %v360_v25  ;;  %v461_v2 = vpop.permute.xlu0 %460 }
 0x104   :  { %v359_v32 = vmul.f32 0.2, %v335_v30  ;;  %1688 = vmatprep.subr.bf16.mxu1 %v399_v21  ;;  %v374_v35 = vmax.f32 %v332_v23, %v358_v29 }
 0x105   :  { %v377_v34 = vmax.f32 %v343_v26, %v361_v31  ;;  %v466_v6 = vpop.permute.xlu1 %465 }
 0x106   :  { %v375_v36 = vmax.f32 %v335_v30, %v359_v32 }
 0x107   :  { %v401_v37 = vpack.c.bf16 %v377_v34, %v376_v33  ;;  %1689 = vmatpush3.bf16.msra.mxu1 %v399_v21  ;;  %v471_v19 = vpop.permute.xlu0 %470 }
 0x108   :  { %v400_v38 = vpack.c.bf16 %v375_v36, %v374_v35 }
 0x109   :  { %v476_v23 = vpop.permute.xlu1 %475 }
 0x10a   :  { %1690 = vmatprep.subr.bf16.mxu1 %v400_v38 }
 0x10b   :  { %1691 = vmatpush3.bf16.msra.mxu1 %v400_v38  ;;  %v481_v33 = vpop.permute.xlu0 %480 }
 0x10c   :  { %1692 = vmatprep.subr.bf16.mxu1 %v401_v37 }
 0x10f   :  { %1693 = vmatpush3.bf16.msra.mxu1 %v401_v37 }
 0x112   :  { %1695 = vmatmul.mubr.bf16.vlgmr.msra.gmra.mrb[0].mxu1 %v1839_v39 }
 0x113   :  { %1698 = vmatprep.mubr.bf16.mxu1 %v1840_v40  ;;  %v486_v40 = vpop.permute.xlu1 %485 }
 0x11a   :  { %1699 = vmatmul.mubr.bf16.gmra.mrb[4].mxu1 %v1841_v41 }
 0x11b   :  { %1702 = vmatprep.mubr.bf16.mxu1 %v1842_v42 }
 0x122   :  { %1703 = vmatmul.mubr.bf16.gmra.mrb[8].mxu1 %v1843_v43 }
 0x123   :  { %1706 = vmatprep.mubr.bf16.mxu1 %v1844_v44 }
 0x12a   :  { %1707 = vmatmul.mubr.bf16.gmra.mrb[12].mxu1 %v1845_v45 }
 0x1e5   :  { %v1696_v54 = vpop.f32.mrb[0].mxu1 }
 0x1e6   :  { %v589_v55 = vadd.f32 %v1696_v54, %v431_v49  ;;  %v580_v56 = vpop.f32.mrb[1].mxu1  ;;  %v496_v54 = vpop.permute.xlu1 %495 }
 0x1e7   :  { %v581_v58 = vadd.f32 %v580_v56, %v421_v47  ;;  %v1697_v59 = vpop.f32.mrb[2].mxu1  ;;  %v491_v47 = vpop.permute.xlu0 %490 }
 0x1e8   :  { %v645_v60 = vmul.f32 0.2, %v589_v55  ;;  %v592_v61 = vadd.f32 %v1697_v59, %v436_v50  ;;  %v583_v62 = vpop.f32.mrb[3].mxu1 }
 0x1e9   :  { %v643_v63 = vmul.f32 0.2, %v581_v58  ;;  %v584_v0 = vadd.f32 %v583_v62, %v426_v48 }
 0x1ea   :  { %v646_v1 = vmul.f32 0.2, %v592_v61  ;;  %v661_v4 = vmax.f32 %v589_v55, %v645_v60 }
 0x1eb   :  { %v644_v3 = vmul.f32 0.2, %v584_v0  ;;  %v659_v7 = vmax.f32 %v581_v58, %v643_v63 }
 0x1ec   :  { %v662_v5 = vmax.f32 %v592_v61, %v646_v1 }
 0x1ed   :  { %v660_v8 = vmax.f32 %v584_v0, %v644_v3  ;;  %v1700_v9 = vpop.f32.mrb[4].mxu1 }
 0x1ee   :  { %v605_v10 = vadd.f32 %v1700_v9, %v451_v53  ;;  %v596_v11 = vpop.f32.mrb[5].mxu1  ;;  %v692_v12 = vpack.c.bf16 %v662_v5, %v661_v4  ;;  %v1849_v9 = vld [vmem:[%s2312_s5 + $0x18] sm:$0xff]  }
 0x1ef   :  { %v597_v13 = vadd.f32 %v596_v11, %v441_v51  ;;  %v1701_v14 = vpop.f32.mrb[6].mxu1  ;;  %v691_v15 = vpack.c.bf16 %v660_v8, %v659_v7  ;;  %v1847_v7 = vld [vmem:[%s2312_s5 + $0x8] sm:$0xff]   ;;  %v1848_v8 = vld [vmem:[%s2312_s5 + $0x10] sm:$0xff]  }
 0x1f0   :  { %v649_v16 = vmul.f32 0.2, %v605_v10  ;;  %v608_v17 = vadd.f32 %v1701_v14, %v456_v57  ;;  %v599_v18 = vpop.f32.mrb[7].mxu1  ;;  %v1851_v11 = vld [vmem:[%s2312_s5 + $0x28] sm:$0xff]   ;;  %v1854_v14 = vld [vmem:[%s2314_s7] sm:$0xff]  }
 0x1f1   :  { %v647_v20 = vmul.f32 0.2, %v597_v13  ;;  %v600_v21 = vadd.f32 %v599_v18, %v446_v52  ;;  %1710 = vmatprep.subr.bf16.mxu0 %v691_v15  ;;  %1758 = vmatprep.mubr.bf16.mxu1 %v1854_v14 }
 0x1f2   :  { %v650_v22 = vmul.f32 0.2, %v608_v17  ;;  %1711 = vmatpush3.bf16.msra.mxu0 %v691_v15  ;;  %v665_v25 = vmax.f32 %v605_v10, %v649_v16  ;;  %v1850_v10 = vld [vmem:[%s2312_s5 + $0x20] sm:$0xff]   ;;  %v718_v15 = vpop.permute.xlu0 %717  ;;  %v723_v16 = vpop.permute.xlu1 %722 }
 0x1f3   :  { %v648_v24 = vmul.f32 0.2, %v600_v21  ;;  %1712 = vmatprep.subr.bf16.mxu0 %v692_v12  ;;  %v663_v27 = vmax.f32 %v597_v13, %v647_v20  ;;  %v1853_v13 = vld [vmem:[%s2312_s5 + $0x38] sm:$0xff]  }
 0x1f4   :  { %v666_v26 = vmax.f32 %v608_v17, %v650_v22 }
 0x1f5   :  { %v664_v28 = vmax.f32 %v600_v21, %v648_v24  ;;  %v1704_v29 = vpop.f32.mrb[8].mxu1 }
 0x1f6   :  { %v621_v30 = vadd.f32 %v1704_v29, %v471_v19  ;;  %v612_v31 = vpop.f32.mrb[9].mxu1  ;;  %1713 = vmatpush3.bf16.msra.mxu0 %v692_v12  ;;  %v694_v32 = vpack.c.bf16 %v666_v26, %v665_v25  ;;  %v1852_v12 = vld [vmem:[%s2312_s5 + $0x30] sm:$0xff]   ;;  %v728_v17 = vpop.permute.xlu0 %727 }
 0x1f7   :  { %v613_v34 = vadd.f32 %v612_v31, %v461_v2  ;;  %v1705_v35 = vpop.f32.mrb[10].mxu1  ;;  %v693_v36 = vpack.c.bf16 %v664_v28, %v663_v27  ;;  %v733_v18 = vpop.permute.xlu1 %732 }
 0x1f8   :  { %v653_v37 = vmul.f32 0.2, %v621_v30  ;;  %v624_v38 = vadd.f32 %v1705_v35, %v476_v23  ;;  %v615_v39 = vpop.f32.mrb[11].mxu1 }
 0x1f9   :  { %v651_v41 = vmul.f32 0.2, %v613_v34  ;;  %v616_v42 = vadd.f32 %v615_v39, %v466_v6  ;;  %1714 = vmatprep.subr.bf16.mxu0 %v693_v36 }
 0x1fa   :  { %v654_v43 = vmul.f32 0.2, %v624_v38  ;;  %1715 = vmatpush3.bf16.msra.mxu0 %v693_v36  ;;  %v669_v45 = vmax.f32 %v621_v30, %v653_v37  ;;  %v738_v19 = vpop.permute.xlu0 %737 }
 0x1fb   :  { %v652_v44 = vmul.f32 0.2, %v616_v42  ;;  %1716 = vmatprep.subr.bf16.mxu0 %v694_v32  ;;  %v667_v48 = vmax.f32 %v613_v34, %v651_v41  ;;  %v743_v20 = vpop.permute.xlu1 %742 }
 0x1fc   :  { %v670_v46 = vmax.f32 %v624_v38, %v654_v43 }
 0x1fd   :  { %v668_v49 = vmax.f32 %v616_v42, %v652_v44  ;;  %v1708_v50 = vpop.f32.mrb[12].mxu1 }
 0x1fe   :  { %v637_v51 = vadd.f32 %v1708_v50, %v491_v47  ;;  %v628_v52 = vpop.f32.mrb[13].mxu1  ;;  %1717 = vmatpush3.bf16.msra.mxu0 %v694_v32  ;;  %v696_v53 = vpack.c.bf16 %v670_v46, %v669_v45  ;;  %v748_v21 = vpop.permute.xlu0 %747 }
 0x1ff   :  { %v629_v55 = vadd.f32 %v628_v52, %v481_v33  ;;  %v1709_v56 = vpop.f32.mrb[14].mxu1  ;;  %v695_v57 = vpack.c.bf16 %v668_v49, %v667_v48  ;;  %v753_v25 = vpop.permute.xlu1 %752 }
 0x200   :  { %v657_v58 = vmul.f32 0.2, %v637_v51  ;;  %v640_v59 = vadd.f32 %v1709_v56, %v496_v54  ;;  %v631_v60 = vpop.f32.mrb[15].mxu1 }
 0x201   :  { %v655_v61 = vmul.f32 0.2, %v629_v55  ;;  %v632_v62 = vadd.f32 %v631_v60, %v486_v40  ;;  %1718 = vmatprep.subr.bf16.mxu0 %v695_v57 }
 0x202   :  { %v658_v63 = vmul.f32 0.2, %v640_v59  ;;  %1719 = vmatpush3.bf16.msra.mxu0 %v695_v57  ;;  %v673_v1 = vmax.f32 %v637_v51, %v657_v58  ;;  %v758_v34 = vpop.permute.xlu0 %757 }
 0x203   :  { %v656_v0 = vmul.f32 0.2, %v632_v62  ;;  %1720 = vmatprep.subr.bf16.mxu0 %v696_v53  ;;  %v671_v3 = vmax.f32 %v629_v55, %v655_v61  ;;  %v763_v38 = vpop.permute.xlu1 %762 }
 0x204   :  { %v674_v2 = vmax.f32 %v640_v59, %v658_v63 }
 0x205   :  { %v672_v4 = vmax.f32 %v632_v62, %v656_v0 }
 0x206   :  { %1721 = vmatpush3.bf16.msra.mxu0 %v696_v53  ;;  %v698_v5 = vpack.c.bf16 %v674_v2, %v673_v1  ;;  %v768_v51 = vpop.permute.xlu0 %767 }
 0x207   :  { %v697_v6 = vpack.c.bf16 %v672_v4, %v671_v3  ;;  %v773_v55 = vpop.permute.xlu1 %772 }
 0x209   :  { %1722 = vmatprep.subr.bf16.mxu0 %v697_v6 }
 0x20a   :  { %1723 = vmatpush3.bf16.msra.mxu0 %v697_v6  ;;  %v778_v1 = vpop.permute.xlu0 %777 }
 0x20b   :  { %1724 = vmatprep.subr.bf16.mxu0 %v698_v5 }
 0x20e   :  { %1725 = vmatpush3.bf16.msra.mxu0 %v698_v5 }
 0x211   :  { %1727 = vmatmul.mubr.bf16.vlgmr.msra.gmra.mrb[16].mxu0 %v1847_v7 }
 0x212   :  { %1730 = vmatprep.mubr.bf16.mxu0 %v1848_v8  ;;  %v783_v8 = vpop.permute.xlu1 %782 }
 0x219   :  { %1731 = vmatmul.mubr.bf16.gmra.mrb[20].mxu0 %v1849_v9 }
 0x21a   :  { %1734 = vmatprep.mubr.bf16.mxu0 %v1850_v10 }
 0x221   :  { %1735 = vmatmul.mubr.bf16.gmra.mrb[24].mxu0 %v1851_v11 }
 0x222   :  { %1738 = vmatprep.mubr.bf16.mxu0 %v1852_v12 }
 0x229   :  { %1739 = vmatmul.mubr.bf16.gmra.mrb[28].mxu0 %v1853_v13 }
 0x2e4   :  { %v1728_v22 = vpop.f32.mrb[16].mxu0 }
 0x2e5   :  { %v886_v23 = vadd.f32 %v1728_v22, %v728_v17  ;;  %v877_v24 = vpop.f32.mrb[17].mxu0  ;;  %v793_v22 = vpop.permute.xlu1 %792 }
 0x2e6   :  { %v878_v26 = vadd.f32 %v877_v24, %v718_v15  ;;  %v1729_v27 = vpop.f32.mrb[18].mxu0  ;;  %v788_v15 = vpop.permute.xlu0 %787 }
 0x2e7   :  { %v942_v28 = vmul.f32 0.2, %v886_v23  ;;  %v889_v29 = vadd.f32 %v1729_v27, %v733_v18  ;;  %v880_v30 = vpop.f32.mrb[19].mxu0 }
 0x2e8   :  { %v940_v31 = vmul.f32 0.2, %v878_v26  ;;  %v881_v32 = vadd.f32 %v880_v30, %v723_v16 }
 0x2e9   :  { %v943_v33 = vmul.f32 0.2, %v889_v29  ;;  %v958_v36 = vmax.f32 %v886_v23, %v942_v28 }
 0x2ea   :  { %v941_v35 = vmul.f32 0.2, %v881_v32  ;;  %v956_v39 = vmax.f32 %v878_v26, %v940_v31 }
 0x2eb   :  { %v959_v37 = vmax.f32 %v889_v29, %v943_v33 }
 0x2ec   :  { %v957_v40 = vmax.f32 %v881_v32, %v941_v35  ;;  %v1732_v41 = vpop.f32.mrb[20].mxu0 }
 0x2ed   :  { %v902_v42 = vadd.f32 %v1732_v41, %v748_v21  ;;  %v893_v43 = vpop.f32.mrb[21].mxu0  ;;  %v989_v44 = vpack.c.bf16 %v959_v37, %v958_v36  ;;  %v1857_v41 = vld [vmem:[%s2314_s7 + $0x18] sm:$0xff]  }
 0x2ee   :  { %v894_v45 = vadd.f32 %v893_v43, %v738_v19  ;;  %v1733_v46 = vpop.f32.mrb[22].mxu0  ;;  %v988_v47 = vpack.c.bf16 %v957_v40, %v956_v39  ;;  %v1855_v39 = vld [vmem:[%s2314_s7 + $0x8] sm:$0xff]   ;;  %v1856_v40 = vld [vmem:[%s2314_s7 + $0x10] sm:$0xff]  }
 0x2ef   :  { %v946_v48 = vmul.f32 0.2, %v902_v42  ;;  %v905_v49 = vadd.f32 %v1733_v46, %v753_v25  ;;  %v896_v50 = vpop.f32.mrb[23].mxu0  ;;  %v1859_v43 = vld [vmem:[%s2314_s7 + $0x28] sm:$0xff]   ;;  %v1862_v46 = vld [vmem:[%s2316_s9] sm:$0xff]  }
 0x2f0   :  { %v944_v52 = vmul.f32 0.2, %v894_v45  ;;  %v897_v53 = vadd.f32 %v896_v50, %v743_v20  ;;  %1742 = vmatprep.subr.bf16.mxu1 %v988_v47  ;;  %1790 = vmatprep.mubr.bf16.mxu0 %v1862_v46 }
 0x2f1   :  { %v947_v54 = vmul.f32 0.2, %v905_v49  ;;  %1743 = vmatpush3.bf16.msra.mxu1 %v988_v47  ;;  %v962_v57 = vmax.f32 %v902_v42, %v946_v48  ;;  %v1858_v42 = vld [vmem:[%s2314_s7 + $0x20] sm:$0xff]   ;;  %v1867_v47 = vld [vmem:[%s2316_s9 + $0x30] sm:$0xff]   ;;  %v1015_v48 = vpop.permute.xlu0 %1014 }
 0x2f2   :  { %v945_v56 = vmul.f32 0.2, %v897_v53  ;;  %1744 = vmatprep.subr.bf16.mxu1 %v989_v44  ;;  %v960_v59 = vmax.f32 %v894_v45, %v944_v52  ;;  %v1861_v45 = vld [vmem:[%s2314_s7 + $0x38] sm:$0xff]  }
 0x2f3   :  { %v963_v58 = vmax.f32 %v905_v49, %v947_v54  ;;  %v1020_v49 = vpop.permute.xlu1 %1019 }
 0x2f4   :  { %v961_v60 = vmax.f32 %v897_v53, %v945_v56  ;;  %v1736_v61 = vpop.f32.mrb[24].mxu0 }
 0x2f5   :  { %v918_v62 = vadd.f32 %v1736_v61, %v768_v51  ;;  %v909_v63 = vpop.f32.mrb[25].mxu0  ;;  %1745 = vmatpush3.bf16.msra.mxu1 %v989_v44  ;;  %v991_v0 = vpack.c.bf16 %v963_v58, %v962_v57  ;;  %v1860_v44 = vld [vmem:[%s2314_s7 + $0x30] sm:$0xff]   ;;  %v1025_v50 = vpop.permute.xlu0 %1024 }
 0x2f6   :  { %v910_v2 = vadd.f32 %v909_v63, %v758_v34  ;;  %v1737_v3 = vpop.f32.mrb[26].mxu0  ;;  %v990_v4 = vpack.c.bf16 %v961_v60, %v960_v59 }
 0x2f7   :  { %v950_v5 = vmul.f32 0.2, %v918_v62  ;;  %v921_v6 = vadd.f32 %v1737_v3, %v773_v55  ;;  %v912_v7 = vpop.f32.mrb[27].mxu0  ;;  %v1030_v51 = vpop.permute.xlu1 %1029 }
 0x2f8   :  { %v948_v9 = vmul.f32 0.2, %v910_v2  ;;  %v913_v10 = vadd.f32 %v912_v7, %v763_v38  ;;  %1746 = vmatprep.subr.bf16.mxu1 %v990_v4 }
 0x2f9   :  { %v951_v11 = vmul.f32 0.2, %v921_v6  ;;  %1747 = vmatpush3.bf16.msra.mxu1 %v990_v4  ;;  %v966_v13 = vmax.f32 %v918_v62, %v950_v5  ;;  %v1035_v52 = vpop.permute.xlu0 %1034 }
 0x2fa   :  { %v949_v12 = vmul.f32 0.2, %v913_v10  ;;  %1748 = vmatprep.subr.bf16.mxu1 %v991_v0  ;;  %v964_v16 = vmax.f32 %v910_v2, %v948_v9 }
 0x2fb   :  { %v967_v14 = vmax.f32 %v921_v6, %v951_v11  ;;  %v1040_v53 = vpop.permute.xlu1 %1039 }
 0x2fc   :  { %v965_v17 = vmax.f32 %v913_v10, %v949_v12  ;;  %v1740_v18 = vpop.f32.mrb[28].mxu0 }
 0x2fd   :  { %v934_v19 = vadd.f32 %v1740_v18, %v788_v15  ;;  %v925_v20 = vpop.f32.mrb[29].mxu0  ;;  %1749 = vmatpush3.bf16.msra.mxu1 %v991_v0  ;;  %v993_v21 = vpack.c.bf16 %v967_v14, %v966_v13  ;;  %v1045_v54 = vpop.permute.xlu0 %1044 }
 0x2fe   :  { %v926_v23 = vadd.f32 %v925_v20, %v778_v1  ;;  %v1741_v24 = vpop.f32.mrb[30].mxu0  ;;  %v992_v25 = vpack.c.bf16 %v965_v17, %v964_v16 }
 0x2ff   :  { %v954_v26 = vmul.f32 0.2, %v934_v19  ;;  %v937_v27 = vadd.f32 %v1741_v24, %v793_v22  ;;  %v928_v28 = vpop.f32.mrb[31].mxu0  ;;  %v1050_v58 = vpop.permute.xlu1 %1049 }
 0x300   :  { %v952_v29 = vmul.f32 0.2, %v926_v23  ;;  %v929_v30 = vadd.f32 %v928_v28, %v783_v8  ;;  %1750 = vmatprep.subr.bf16.mxu1 %v992_v25 }
 0x301   :  { %v955_v31 = vmul.f32 0.2, %v937_v27  ;;  %1751 = vmatpush3.bf16.msra.mxu1 %v992_v25  ;;  %v970_v33 = vmax.f32 %v934_v19, %v954_v26  ;;  %v1055_v3 = vpop.permute.xlu0 %1054 }
 0x302   :  { %v953_v32 = vmul.f32 0.2, %v929_v30  ;;  %1752 = vmatprep.subr.bf16.mxu1 %v993_v21  ;;  %v968_v35 = vmax.f32 %v926_v23, %v952_v29 }
 0x303   :  { %v971_v34 = vmax.f32 %v937_v27, %v955_v31  ;;  %v1060_v7 = vpop.permute.xlu1 %1059 }
 0x304   :  { %v969_v36 = vmax.f32 %v929_v30, %v953_v32 }
 0x305   :  { %1753 = vmatpush3.bf16.msra.mxu1 %v993_v21  ;;  %v995_v37 = vpack.c.bf16 %v971_v34, %v970_v33  ;;  %v1065_v20 = vpop.permute.xlu0 %1064 }
 0x306   :  { %v994_v38 = vpack.c.bf16 %v969_v36, %v968_v35 }
 0x307   :  { %v1070_v24 = vpop.permute.xlu1 %1069 }
 0x308   :  { %1754 = vmatprep.subr.bf16.mxu1 %v994_v38 }
 0x309   :  { %1755 = vmatpush3.bf16.msra.mxu1 %v994_v38  ;;  %v1075_v34 = vpop.permute.xlu0 %1074 }
 0x30a   :  { %1756 = vmatprep.subr.bf16.mxu1 %v995_v37 }
 0x30d   :  { %1757 = vmatpush3.bf16.msra.mxu1 %v995_v37 }
 0x310   :  { %1759 = vmatmul.mubr.bf16.vlgmr.msra.gmra.mrb[16].mxu1 %v1855_v39 }
 0x311   :  { %1762 = vmatprep.mubr.bf16.mxu1 %v1856_v40 }
 0x318   :  { %1763 = vmatmul.mubr.bf16.gmra.mrb[20].mxu1 %v1857_v41  ;;  %v1080_v41 = vpop.permute.xlu1 %1079 }
 0x319   :  { %1766 = vmatprep.mubr.bf16.mxu1 %v1858_v42 }
 0x320   :  { %1767 = vmatmul.mubr.bf16.gmra.mrb[24].mxu1 %v1859_v43 }
 0x321   :  { %1770 = vmatprep.mubr.bf16.mxu1 %v1860_v44 }
 0x328   :  { %1771 = vmatmul.mubr.bf16.gmra.mrb[28].mxu1 %v1861_v45 }
 0x329   :  { %1802 = vmatprep.mubr.bf16.mxu1 %v1867_v47 }
 0x3e3   :  { %v1760_v55 = vpop.f32.mrb[16].mxu1 }
 0x3e4   :  { %v1183_v56 = vadd.f32 %v1760_v55, %v1025_v50  ;;  %v1174_v57 = vpop.f32.mrb[17].mxu1  ;;  %v1090_v55 = vpop.permute.xlu1 %1089 }
 0x3e5   :  { %v1175_v59 = vadd.f32 %v1174_v57, %v1015_v48  ;;  %v1761_v60 = vpop.f32.mrb[18].mxu1  ;;  %v1085_v48 = vpop.permute.xlu0 %1084 }
 0x3e6   :  { %v1239_v61 = vmul.f32 0.2, %v1183_v56  ;;  %v1186_v62 = vadd.f32 %v1761_v60, %v1030_v51  ;;  %v1177_v63 = vpop.f32.mrb[19].mxu1 }
 0x3e7   :  { %v1237_v0 = vmul.f32 0.2, %v1175_v59  ;;  %v1178_v1 = vadd.f32 %v1177_v63, %v1020_v49 }
 0x3e8   :  { %v1240_v2 = vmul.f32 0.2, %v1186_v62  ;;  %v1255_v5 = vmax.f32 %v1183_v56, %v1239_v61 }
 0x3e9   :  { %v1238_v4 = vmul.f32 0.2, %v1178_v1  ;;  %v1253_v8 = vmax.f32 %v1175_v59, %v1237_v0 }
 0x3ea   :  { %v1256_v6 = vmax.f32 %v1186_v62, %v1240_v2 }
 0x3eb   :  { %v1254_v9 = vmax.f32 %v1178_v1, %v1238_v4  ;;  %v1764_v10 = vpop.f32.mrb[20].mxu1 }
 0x3ec   :  { %v1286_v11 = vpack.c.bf16 %v1256_v6, %v1255_v5  ;;  %v1199_v12 = vadd.f32 %v1764_v10, %v1045_v54  ;;  %v1190_v13 = vpop.f32.mrb[21].mxu1  ;;  %v1864_v10 = vld [vmem:[%s2316_s9 + $0x10] sm:$0xff]  }
 0x3ed   :  { %v1285_v14 = vpack.c.bf16 %v1254_v9, %v1253_v8  ;;  %v1191_v15 = vadd.f32 %v1190_v13, %v1035_v52  ;;  %v1765_v16 = vpop.f32.mrb[22].mxu1  ;;  %v1863_v8 = vld [vmem:[%s2316_s9 + $0x8] sm:$0xff]   ;;  %v1869_v9 = vld [vmem:[%s2316_s9 + $0x38] sm:$0xff]  }
 0x3ee   :  { %v1243_v17 = vmul.f32 0.2, %v1199_v12  ;;  %v1202_v18 = vadd.f32 %v1765_v16, %v1050_v58  ;;  %v1193_v19 = vpop.f32.mrb[23].mxu1  ;;  %v1868_v13 = vld [vmem:[%s2316_s9 + $0x28] sm:$0xff]  }
 0x3ef   :  { %v1241_v21 = vmul.f32 0.2, %v1191_v15  ;;  %v1194_v22 = vadd.f32 %v1193_v19, %v1040_v53  ;;  %1774 = vmatprep.subr.bf16.mxu0 %v1285_v14  ;;  %1806 = vmatprep.subr.bf16.mxu1 %v1285_v14 }
 0x3f0   :  { %v1244_v23 = vmul.f32 0.2, %v1202_v18  ;;  %1775 = vmatpush3.bf16.msra.mxu0 %v1285_v14  ;;  %1814 = vmatpush3.bf16.msra.mxu1 %v1285_v14  ;;  %v1259_v26 = vmax.f32 %v1199_v12, %v1243_v17  ;;  %v1866_v12 = vld [vmem:[%s2316_s9 + $0x20] sm:$0xff]   ;;  %v1312_v14 = vpop.permute.xlu0 %1311 }
 0x3f1   :  { %v1242_v25 = vmul.f32 0.2, %v1194_v22  ;;  %1776 = vmatprep.subr.bf16.mxu0 %v1286_v11  ;;  %1807 = vmatprep.subr.bf16.mxu1 %v1286_v11  ;;  %v1257_v28 = vmax.f32 %v1191_v15, %v1241_v21 }
 0x3f2   :  { %v1260_v27 = vmax.f32 %v1202_v18, %v1244_v23 }
 0x3f3   :  { %v1258_v29 = vmax.f32 %v1194_v22, %v1242_v25  ;;  %v1768_v30 = vpop.f32.mrb[24].mxu1 }
 0x3f4   :  { %v1288_v31 = vpack.c.bf16 %v1260_v27, %v1259_v26  ;;  %v1215_v32 = vadd.f32 %v1768_v30, %v1065_v20  ;;  %v1206_v33 = vpop.f32.mrb[25].mxu1  ;;  %1777 = vmatpush3.bf16.msra.mxu0 %v1286_v11  ;;  %1815 = vmatpush3.bf16.msra.mxu1 %v1286_v11  ;;  %v1865_v11 = vld [vmem:[%s2316_s9 + $0x18] sm:$0xff]   ;;  %s1899_s9 = smov [#allocation2]  }
 0x3f5   :  { %v1287_v35 = vpack.c.bf16 %v1258_v29, %v1257_v28  ;;  %v1207_v36 = vadd.f32 %v1206_v33, %v1055_v3  ;;  %v1769_v37 = vpop.f32.mrb[26].mxu1  ;;  %s1518_s23 = sshll.u32 %s1899_s9, 4  ;;  %s1519_s23 = int_to_ptr.vmem [resolvable:$true] %s1518_s23 }
 0x3f6   :  { %v1247_v38 = vmul.f32 0.2, %v1215_v32  ;;  %v1218_v39 = vadd.f32 %v1769_v37, %v1070_v24  ;;  %v1209_v40 = vpop.f32.mrb[27].mxu1  ;;  %s1874_s24 = scalar_lea.vmem %s1519_s23, 16  ;;  %s1878_s25 = scalar_lea.vmem %s1519_s23, 32 }
 0x3f7   :  { %v1245_v42 = vmul.f32 0.2, %v1207_v36  ;;  %v1210_v43 = vadd.f32 %v1209_v40, %v1060_v7  ;;  %1778 = vmatprep.subr.bf16.mxu0 %v1287_v35  ;;  %1808 = vmatprep.subr.bf16.mxu1 %v1287_v35  ;;  %p1875_p0 = scmp.ne.s32.totalorder %s1519_s23, %s1874_s24  ;;  %p1879_p1 = scmp.lt.s32.totalorder %s1519_s23, %s1519_s23 }
 0x3f8   :  { %v1248_v44 = vmul.f32 0.2, %v1218_v39  ;;  %1779 = vmatpush3.bf16.msra.mxu0 %v1287_v35  ;;  %1816 = vmatpush3.bf16.msra.mxu1 %v1287_v35  ;;  %v1263_v46 = vmax.f32 %v1215_v32, %v1247_v38  ;;  %p1880_p2 = scmp.lt.s32.totalorder %s1878_s25, %s1874_s24 }
 0x3f9   :  { %v1246_v45 = vmul.f32 0.2, %v1210_v43  ;;  %1780 = vmatprep.subr.bf16.mxu0 %v1288_v31  ;;  %1809 = vmatprep.subr.bf16.mxu1 %v1288_v31  ;;  %v1261_v49 = vmax.f32 %v1207_v36, %v1245_v42 }
 0x3fa   :  { %v1264_v47 = vmax.f32 %v1218_v39, %v1248_v44  ;;  %p1881_p3 = por %p1880_p2, %p1879_p1 }
 0x3fb   :  { %v1262_v50 = vmax.f32 %v1210_v43, %v1246_v45  ;;  %v1772_v51 = vpop.f32.mrb[28].mxu1 }
 0x3fc   :  { %v1290_v52 = vpack.c.bf16 %v1264_v47, %v1263_v46  ;;  %v1231_v53 = vadd.f32 %v1772_v51, %v1085_v48  ;;  %v1222_v54 = vpop.f32.mrb[29].mxu1  ;;  %1781 = vmatpush3.bf16.msra.mxu0 %v1288_v31  ;;  %1817 = vmatpush3.bf16.msra.mxu1 %v1288_v31  ;;  %p1882_p4 = pnand %p1881_p3, %p1875_p0 }
 0x3fd   :  { %v1289_v56 = vpack.c.bf16 %v1262_v50, %v1261_v49  ;;  %v1223_v57 = vadd.f32 %v1222_v54, %v1075_v34  ;;  %v1773_v58 = vpop.f32.mrb[30].mxu1 }
 0x3fe   :  { %v1251_v59 = vmul.f32 0.2, %v1231_v53  ;;  %v1234_v60 = vadd.f32 %v1773_v58, %v1090_v55  ;;  %v1225_v61 = vpop.f32.mrb[31].mxu1 }
 0x3ff   :  { %v1249_v62 = vmul.f32 0.2, %v1223_v57  ;;  %v1226_v63 = vadd.f32 %v1225_v61, %v1080_v41  ;;  %1782 = vmatprep.subr.bf16.mxu0 %v1289_v56  ;;  %1810 = vmatprep.subr.bf16.mxu1 %v1289_v56 }
 0x400   :  { %v1252_v0 = vmul.f32 0.2, %v1234_v60  ;;  %1783 = vmatpush3.bf16.msra.mxu0 %v1289_v56  ;;  %1818 = vmatpush3.bf16.msra.mxu1 %v1289_v56  ;;  %v1267_v2 = vmax.f32 %v1231_v53, %v1251_v59 }
 0x401   :  { %v1250_v1 = vmul.f32 0.2, %v1226_v63  ;;  %1784 = vmatprep.subr.bf16.mxu0 %v1290_v52  ;;  %1811 = vmatprep.subr.bf16.mxu1 %v1290_v52  ;;  %v1265_v4 = vmax.f32 %v1223_v57, %v1249_v62 }
 0x402   :  { %v1268_v3 = vmax.f32 %v1234_v60, %v1252_v0 }
 0x403   :  { %v1266_v5 = vmax.f32 %v1226_v63, %v1250_v1 }
 0x404   :  { %v1292_v6 = vpack.c.bf16 %v1268_v3, %v1267_v2  ;;  %1785 = vmatpush3.bf16.msra.mxu0 %v1290_v52  ;;  %1819 = vmatpush3.bf16.msra.mxu1 %v1290_v52 }
 0x405   :  { %v1291_v7 = vpack.c.bf16 %v1266_v5, %v1265_v4 }
 0x407   :  { %1786 = vmatprep.subr.bf16.mxu0 %v1291_v7  ;;  %1812 = vmatprep.subr.bf16.mxu1 %v1291_v7 }
 0x408   :  { %1787 = vmatpush3.bf16.msra.mxu0 %v1291_v7  ;;  %1820 = vmatpush3.bf16.msra.mxu1 %v1291_v7 }
 0x409   :  { %1788 = vmatprep.subr.bf16.mxu0 %v1292_v6  ;;  %1813 = vmatprep.subr.bf16.mxu1 %v1292_v6 }
 0x40c   :  { %1789 = vmatpush3.bf16.msra.mxu0 %v1292_v6  ;;  %1821 = vmatpush3.bf16.msra.mxu1 %v1292_v6 }
 0x40f   :  { %1791 = vmatmul.mubr.bf16.vlgmr.msra.gmra.mrb[32].mxu0 %v1863_v8  ;;  %1803 = vmatmul.mubr.bf16.vlgmr.msra.gmra.mrb[32].mxu1 %v1869_v9 }
 0x410   :  { %1794 = vmatprep.mubr.bf16.mxu0 %v1864_v10 }
 0x417   :  { %1795 = vmatmul.mubr.bf16.gmra.mrb[36].mxu0 %v1865_v11 }
 0x418   :  { %1798 = vmatprep.mubr.bf16.mxu0 %v1866_v12 }
 0x41f   :  { %1799 = vmatmul.mubr.bf16.gmra.mrb[40].mxu0 %v1868_v13 }
 0x4e2   :  { %v1792_v15 = vpop.f32.mrb[32].mxu0  ;;  %v1804_v16 = vpop.f32.mrb[32].mxu1 }
 0x4e3   :  { %v1456_v17 = vpop.f32.mrb[33].mxu0  ;;  %v1493_v18 = vpop.f32.mrb[33].mxu1 }
 0x4e4   :  { %v1457_v19 = vadd.f32 %v1456_v17, %v1312_v14  ;;  %v1793_v20 = vpop.f32.mrb[34].mxu0  ;;  %v1805_v21 = vpop.f32.mrb[34].mxu1 }
 0x4e5   :  { %v1459_v22 = vpop.f32.mrb[35].mxu0  ;;  %v1495_v23 = vpop.f32.mrb[35].mxu1 }
 0x4e6   :  { %v1504_v24 = vsub.f32 0.0, %v1457_v19 }
 0x4e8   :  { %v1505_v25 = vmul.f32 1.442695, %v1504_v24 }
 0x4ea   :  { %1870 = vpow2.f32 %v1505_v25  ;;  %v1796_v26 = vpop.f32.mrb[36].mxu0 }
 0x4eb   :  { %v1469_v27 = vpop.f32.mrb[37].mxu0 }
 0x4ec   :  { %v1797_v28 = vpop.f32.mrb[38].mxu0 }
 0x4ed   :  { %v1471_v29 = vpop.f32.mrb[39].mxu0 }
 0x4f2   :  { %v1800_v30 = vpop.f32.mrb[40].mxu0 }
 0x4f3   :  { %v1481_v31 = vpop.f32.mrb[41].mxu0 }
 0x4f4   :  { %v1871_v32 = vpop.eup %1870  ;;  %v1801_v33 = vpop.f32.mrb[42].mxu0 }
 0x4f5   :  { %v1507_v34 = vadd.f32 1.0, %v1871_v32  ;;  %v1483_v35 = vpop.f32.mrb[43].mxu0 }
 0x4f7   :  { %1872 = vrcp.f32 %v1507_v34 }
 0x501   :  { %v1873_v36 = vpop.eup %1872 }
 0x502   :  { %1511 = vst.msk [vmem:[#allocation2] sm:$0x1] %vm1510_vm1, %v1873_v36 }
 0x503   :  { %1885 = shalt.err (!%p1882_p4)
}
 0x504   :  { %s1886_s27 = scalar_lea.hbm %s2318_s11, 16 }
 0x505   :  { %p1887_p5 = scmp.ne.s32.totalorder %s2318_s11, %s1886_s27  ;;  %p1890_p6 = scmp.lt.u32.totalorder %s1886_s27, %s2318_s11 }
 0x507   :  { %p1892_p7 = pnand %p1890_p6, %p1887_p5 }
 0x509   :  { %1895 = shalt.err (!%p1892_p7)
}
 0x50a   :  { %1521 = dma.vmem_to_hbm [thread:$0]  %s1519_s23, 16, %s2318_s11, [#allocation3]  }
 0x50b   :  { %1896 = dma.done.wait [#allocation3], 16  }
 0x50c   :  { %1897 = vsyncadd [#allocation3], 4294967280 }
 0x50d   :  { %1525 = vsyncpa [#allocation3], 1 }

// kernel: tpu_custom_call.1
= control target key start
LH: loop header
LB: loop body
LE: loop exit
PB: predicated region body
PF: predicated region fallthrough
CT: control target
= control target key end

     0   :  { %v1898_v2 = vmov 0   ;;  %vm224_vm0 = vcmask 523264   ;;  %s2307_s0 = inlined_call_operand.vmem [shape: bf16[64,8], index: 0, kind: input, shape index: {}]   ;;  %s2308_s1 = inlined_call_operand.vmem [shape: bf16[128,64], index: 1, kind: input, shape index: {}]   ;;  %s2309_s2 = inlined_call_operand.vmem [shape: f32[128,1], index: 2, kind: input, shape index: {}]   ;;  %s2310_s3 = inlined_call_operand.vmem [shape: bf16[128,128], index: 3, kind: input, shape index: {}]   ;;  %s2311_s4 = inlined_call_operand.vmem [shape: f32[128,1], index: 4, kind: input, shape index: {}]   ;;  %s2312_s5 = inlined_call_operand.vmem [shape: bf16[128,128], index: 5, kind: input, shape index: {}]   ;;  %s2313_s6 = inlined_call_operand.vmem [shape: f32[128,1], index: 6, kind: input, shape index: {}]   ;;  %s2314_s7 = inlined_call_operand.vmem [shape: bf16[128,128], index: 7, kind: input, shape index: {}]   ;;  %s2315_s8 = inlined_call_operand.vmem [shape: f32[128,1], index: 8, kind: input, shape index: {}]   ;;  %s2316_s9 = inlined_call_operand.vmem [shape: bf16[128,128], index: 9, kind: input, shape index: {}]   ;;  %s2317_s10 = inlined_call_operand.vmem [shape: f32[128,1], index: 10, kind: input, shape index: {}]   ;;  %s2318_s11 = inlined_call_operand.hbm [shape: f32[1,1,8], index: 11, kind: output, shape index: {}]  }
   0x1   :  { %v66_v0 = vld [vmem:[%s2309_s2 + $0x10] sm:$0xff]  ;;  %v64_v1 = vld [vmem:[%s2309_s2] sm:$0xff]  ;;  %1825 = vset.pattern.permute.xlu1 %v1898_v2  ;;  %1824 = vset.pattern.permute.xlu0 %v1898_v2  ;;  %v67_v4 = vld [vmem:[%s2309_s2 + $0x18] sm:$0xff] }
   0x2   :  { %v1826_v3 = vld [vmem:[%s2307_s0] sm:$0xff]   ;;  %92 = vperm.xlu1 %1825, %v66_v0   ;;  %82 = vperm.xlu0 %1824, %v64_v1   ;;  %v65_v5 = vld [vmem:[%s2309_s2 + $0x8] sm:$0xff]  ;;  %v1828_v7 = vld [vmem:[%s2307_s0 + $0x10] sm:$0xff]  }
   0x3   :  { %1654 = vmatprep.subr.bf16.mxu0 %v1826_v3  ;;  %v1827_v6 = vld [vmem:[%s2307_s0 + $0x8] sm:$0xff]   ;;  %v68_v9 = vld [vmem:[%s2309_s2 + $0x20] sm:$0xff]  ;;  %v1829_v11 = vld [vmem:[%s2307_s0 + $0x18] sm:$0xff]  }
   0x4   :  { %1655 = vmatpush3.bf16.msra.mxu0 %v1826_v3  ;;  %v69_v8 = vld [vmem:[%s2309_s2 + $0x28] sm:$0xff]  ;;  %v1830_v10 = vld [vmem:[%s2308_s1] sm:$0xff]   ;;  %v71_v12 = vld [vmem:[%s2309_s2 + $0x38] sm:$0xff] }
   0x5   :  { %1656 = vmatprep.subr.bf16.mxu0 %v1827_v6  ;;  %v70_v13 = vld [vmem:[%s2309_s2 + $0x30] sm:$0xff]  ;;  %1662 = vmatprep.mubr.msk.bf16.mxu0 %vm224_vm0, %v1830_v10  ;;  %v73_v14 = vld [vmem:[%s2309_s2 + $0x48] sm:$0xff]  ;;  %v72_v15 = vld [vmem:[%s2309_s2 + $0x40] sm:$0xff] }
   0x6   :  { %97 = vperm.xlu1 %1825, %v67_v4   ;;  %87 = vperm.xlu0 %1824, %v65_v5   ;;  %v1831_v16 = vld [vmem:[%s2308_s1 + $0x8] sm:$0xff]   ;;  %v1832_v17 = vld [vmem:[%s2308_s1 + $0x10] sm:$0xff]   ;;  %v75_v18 = vld [vmem:[%s2309_s2 + $0x58] sm:$0xff] }
   0x7   :  { %v74_v19 = vld [vmem:[%s2309_s2 + $0x50] sm:$0xff]  ;;  %v77_v20 = vld [vmem:[%s2309_s2 + $0x68] sm:$0xff]  ;;  %v76_v21 = vld [vmem:[%s2309_s2 + $0x60] sm:$0xff] }
   0x8   :  { %1657 = vmatpush3.bf16.msra.mxu0 %v1827_v6  ;;  %v1833_v22 = vld [vmem:[%s2308_s1 + $0x18] sm:$0xff]   ;;  %v1834_v23 = vld [vmem:[%s2308_s1 + $0x20] sm:$0xff]   ;;  %v78_v25 = vld [vmem:[%s2309_s2 + $0x70] sm:$0xff] }
   0x9   :  { %1658 = vmatprep.subr.bf16.mxu0 %v1828_v7  ;;  %v79_v24 = vld [vmem:[%s2309_s2 + $0x78] sm:$0xff]  ;;  %v403_v26 = vld [vmem:[%s2311_s4 + $0x8] sm:$0xff]  ;;  %v402_v27 = vld [vmem:[%s2311_s4] sm:$0xff] }
   0xa   :  { %107 = vperm.xlu1 %1825, %v69_v8   ;;  %102 = vperm.xlu0 %1824, %v68_v9   ;;  %v1835_v28 = vld [vmem:[%s2308_s1 + $0x28] sm:$0xff]   ;;  %v1836_v29 = vld [vmem:[%s2308_s1 + $0x30] sm:$0xff]   ;;  %v405_v30 = vld [vmem:[%s2311_s4 + $0x18] sm:$0xff] }
   0xb   :  { %v404_v31 = vld [vmem:[%s2311_s4 + $0x10] sm:$0xff]  ;;  %v407_v32 = vld [vmem:[%s2311_s4 + $0x28] sm:$0xff]  ;;  %v406_v33 = vld [vmem:[%s2311_s4 + $0x20] sm:$0xff] }
   0xc   :  { %1659 = vmatpush3.bf16.msra.mxu0 %v1828_v7  ;;  %v1837_v34 = vld [vmem:[%s2308_s1 + $0x38] sm:$0xff]   ;;  %v408_v36 = vld [vmem:[%s2311_s4 + $0x30] sm:$0xff]  ;;  %v411_v37 = vld [vmem:[%s2311_s4 + $0x48] sm:$0xff] }
   0xd   :  { %1660 = vmatprep.subr.bf16.mxu0 %v1829_v11  ;;  %v409_v35 = vld [vmem:[%s2311_s4 + $0x38] sm:$0xff]  ;;  %v410_v38 = vld [vmem:[%s2311_s4 + $0x40] sm:$0xff]  ;;  %v412_v40 = vld [vmem:[%s2311_s4 + $0x50] sm:$0xff] }
   0xe   :  { %117 = vperm.xlu1 %1825, %v71_v12   ;;  %112 = vperm.xlu0 %1824, %v70_v13   ;;  %v413_v39 = vld [vmem:[%s2311_s4 + $0x58] sm:$0xff]  ;;  %v415_v41 = vld [vmem:[%s2311_s4 + $0x68] sm:$0xff]  ;;  %v414_v42 = vld [vmem:[%s2311_s4 + $0x60] sm:$0xff] }
  0x10   :  { %1661 = vmatpush3.bf16.msra.mxu0 %v1829_v11 }
  0x12   :  { %127 = vperm.xlu1 %1825, %v73_v14   ;;  %122 = vperm.xlu0 %1824, %v72_v15  }
  0x13   :  { %1663 = vmatmul.mubr.msk.bf16.vlgmr.msra.gmra.mrb[0].mxu0 %vm224_vm0, %v1831_v16 }
  0x14   :  { %1666 = vmatprep.mubr.msk.bf16.mxu0 %vm224_vm0, %v1832_v17 }
  0x16   :  { %137 = vperm.xlu1 %1825, %v75_v18   ;;  %132 = vperm.xlu0 %1824, %v74_v19  }
  0x1a   :  { %147 = vperm.xlu1 %1825, %v77_v20   ;;  %142 = vperm.xlu0 %1824, %v76_v21  }
  0x1b   :  { %1667 = vmatmul.mubr.msk.bf16.gmra.mrb[4].mxu0 %vm224_vm0, %v1833_v22 }
  0x1c   :  { %1670 = vmatprep.mubr.msk.bf16.mxu0 %vm224_vm0, %v1834_v23 }
  0x1e   :  { %157 = vperm.xlu1 %1825, %v79_v24   ;;  %152 = vperm.xlu0 %1824, %v78_v25  }
  0x22   :  { %425 = vperm.xlu1 %1825, %v403_v26   ;;  %420 = vperm.xlu0 %1824, %v402_v27  }
  0x23   :  { %1671 = vmatmul.mubr.msk.bf16.gmra.mrb[8].mxu0 %vm224_vm0, %v1835_v28 }
  0x24   :  { %1674 = vmatprep.mubr.msk.bf16.mxu0 %vm224_vm0, %v1836_v29 }
  0x26   :  { %435 = vperm.xlu1 %1825, %v405_v30   ;;  %430 = vperm.xlu0 %1824, %v404_v31  }
  0x2a   :  { %445 = vperm.xlu1 %1825, %v407_v32   ;;  %440 = vperm.xlu0 %1824, %v406_v33  }
  0x2b   :  { %1675 = vmatmul.mubr.msk.bf16.gmra.mrb[12].mxu0 %vm224_vm0, %v1837_v34 }
  0x2e   :  { %455 = vperm.xlu1 %1825, %v409_v35   ;;  %450 = vperm.xlu0 %1824, %v408_v36  }
  0x32   :  { %465 = vperm.xlu1 %1825, %v411_v37   ;;  %460 = vperm.xlu0 %1824, %v410_v38  }
  0x36   :  { %475 = vperm.xlu1 %1825, %v413_v39   ;;  %470 = vperm.xlu0 %1824, %v412_v40  }
  0x37   :  { %16 = vsyncpa [#allocation3], 0  ;;  %v417_v43 = vld [vmem:[%s2311_s4 + $0x78] sm:$0xff]  ;;  %v416_v44 = vld [vmem:[%s2311_s4 + $0x70] sm:$0xff]  ;;  %vm1510_vm1 = vcmask 57344  }
  0x38   :  { %v700_v45 = vld [vmem:[%s2313_s6 + $0x8] sm:$0xff]  ;;  %v699_v46 = vld [vmem:[%s2313_s6] sm:$0xff]  ;;  %v702_v47 = vld [vmem:[%s2313_s6 + $0x18] sm:$0xff] }
  0x39   :  { %v701_v48 = vld [vmem:[%s2313_s6 + $0x10] sm:$0xff]  ;;  %v704_v49 = vld [vmem:[%s2313_s6 + $0x28] sm:$0xff]  ;;  %v703_v50 = vld [vmem:[%s2313_s6 + $0x20] sm:$0xff] }
  0x3a   :  { %485 = vperm.xlu1 %1825, %v415_v41   ;;  %480 = vperm.xlu0 %1824, %v414_v42   ;;  %v706_v51 = vld [vmem:[%s2313_s6 + $0x38] sm:$0xff]  ;;  %v705_v52 = vld [vmem:[%s2313_s6 + $0x30] sm:$0xff]  ;;  %v708_v53 = vld [vmem:[%s2313_s6 + $0x48] sm:$0xff] }
  0x3b   :  { %v707_v54 = vld [vmem:[%s2313_s6 + $0x40] sm:$0xff]  ;;  %v710_v55 = vld [vmem:[%s2313_s6 + $0x58] sm:$0xff]  ;;  %v709_v56 = vld [vmem:[%s2313_s6 + $0x50] sm:$0xff] }
  0x3c   :  { %v712_v57 = vld [vmem:[%s2313_s6 + $0x68] sm:$0xff]  ;;  %v711_v58 = vld [vmem:[%s2313_s6 + $0x60] sm:$0xff]  ;;  %v714_v59 = vld [vmem:[%s2313_s6 + $0x78] sm:$0xff] }
  0x3d   :  { %v713_v60 = vld [vmem:[%s2313_s6 + $0x70] sm:$0xff]  ;;  %v997_v61 = vld [vmem:[%s2315_s8 + $0x8] sm:$0xff]  ;;  %v996_v62 = vld [vmem:[%s2315_s8] sm:$0xff] }
  0x3e   :  { %495 = vperm.xlu1 %1825, %v417_v43   ;;  %490 = vperm.xlu0 %1824, %v416_v44   ;;  %v999_v63 = vld [vmem:[%s2315_s8 + $0x18] sm:$0xff]  ;;  %v998_v0 = vld [vmem:[%s2315_s8 + $0x10] sm:$0xff]  ;;  %v1001_v1 = vld [vmem:[%s2315_s8 + $0x28] sm:$0xff] }
  0x3f   :  { %v1000_v2 = vld [vmem:[%s2315_s8 + $0x20] sm:$0xff]  ;;  %v1003_v3 = vld [vmem:[%s2315_s8 + $0x38] sm:$0xff]  ;;  %v1002_v4 = vld [vmem:[%s2315_s8 + $0x30] sm:$0xff] }
  0x40   :  { %v1005_v5 = vld [vmem:[%s2315_s8 + $0x48] sm:$0xff]  ;;  %v1004_v6 = vld [vmem:[%s2315_s8 + $0x40] sm:$0xff]  ;;  %v1007_v7 = vld [vmem:[%s2315_s8 + $0x58] sm:$0xff] }
  0x41   :  { %v1006_v8 = vld [vmem:[%s2315_s8 + $0x50] sm:$0xff]  ;;  %v1009_v9 = vld [vmem:[%s2315_s8 + $0x68] sm:$0xff]  ;;  %v1008_v10 = vld [vmem:[%s2315_s8 + $0x60] sm:$0xff] }
  0x42   :  { %722 = vperm.xlu1 %1825, %v700_v45   ;;  %717 = vperm.xlu0 %1824, %v699_v46   ;;  %v1011_v11 = vld [vmem:[%s2315_s8 + $0x78] sm:$0xff]  ;;  %v1010_v12 = vld [vmem:[%s2315_s8 + $0x70] sm:$0xff]  ;;  %v1293_v13 = vld [vmem:[%s2317_s10] sm:$0xff] }
  0x43   :  { %v1838_v14 = vld [vmem:[%s2310_s3] sm:$0xff]  }
  0x44   :  { %1694 = vmatprep.mubr.bf16.mxu1 %v1838_v14 }
  0x46   :  { %732 = vperm.xlu1 %1825, %v702_v47   ;;  %727 = vperm.xlu0 %1824, %v701_v48  }
  0x4a   :  { %742 = vperm.xlu1 %1825, %v704_v49   ;;  %737 = vperm.xlu0 %1824, %v703_v50  }
  0x4e   :  { %752 = vperm.xlu1 %1825, %v706_v51   ;;  %747 = vperm.xlu0 %1824, %v705_v52  }
  0x52   :  { %762 = vperm.xlu1 %1825, %v708_v53   ;;  %757 = vperm.xlu0 %1824, %v707_v54  }
  0x56   :  { %772 = vperm.xlu1 %1825, %v710_v55   ;;  %767 = vperm.xlu0 %1824, %v709_v56  }
  0x5a   :  { %782 = vperm.xlu1 %1825, %v712_v57   ;;  %777 = vperm.xlu0 %1824, %v711_v58  }
  0x5e   :  { %792 = vperm.xlu1 %1825, %v714_v59   ;;  %787 = vperm.xlu0 %1824, %v713_v60  }
  0x62   :  { %1019 = vperm.xlu1 %1825, %v997_v61   ;;  %1014 = vperm.xlu0 %1824, %v996_v62  }
  0x66   :  { %1029 = vperm.xlu1 %1825, %v999_v63   ;;  %1024 = vperm.xlu0 %1824, %v998_v0  }
  0x6a   :  { %1039 = vperm.xlu1 %1825, %v1001_v1   ;;  %1034 = vperm.xlu0 %1824, %v1000_v2  }
  0x6e   :  { %1049 = vperm.xlu1 %1825, %v1003_v3   ;;  %1044 = vperm.xlu0 %1824, %v1002_v4  }
  0x72   :  { %1059 = vperm.xlu1 %1825, %v1005_v5   ;;  %1054 = vperm.xlu0 %1824, %v1004_v6  }
  0x76   :  { %1069 = vperm.xlu1 %1825, %v1007_v7   ;;  %1064 = vperm.xlu0 %1824, %v1006_v8  }
  0x7a   :  { %1079 = vperm.xlu1 %1825, %v1009_v9   ;;  %1074 = vperm.xlu0 %1824, %v1008_v10  }
  0x7e   :  { %1089 = vperm.xlu1 %1825, %v1011_v11   ;;  %1084 = vperm.xlu0 %1824, %v1010_v12  }
  0x81   :  { %v83_v15 = vpop.permute.xlu0 %82  ;;  %v93_v16 = vpop.permute.xlu1 %92 }
  0x82   :  { %1311 = vperm.xlu0 %1824, %v1293_v13  }
  0x85   :  { %v88_v17 = vpop.permute.xlu0 %87  ;;  %v98_v18 = vpop.permute.xlu1 %97 }
  0x89   :  { %v103_v19 = vpop.permute.xlu0 %102  ;;  %v108_v20 = vpop.permute.xlu1 %107 }
  0x8d   :  { %v113_v21 = vpop.permute.xlu0 %112  ;;  %v118_v25 = vpop.permute.xlu1 %117 }
  0x91   :  { %v123_v34 = vpop.permute.xlu0 %122  ;;  %v128_v38 = vpop.permute.xlu1 %127 }
  0x95   :  { %v133_v50 = vpop.permute.xlu0 %132  ;;  %v138_v55 = vpop.permute.xlu1 %137 }
  0x99   :  { %v143_v1 = vpop.permute.xlu0 %142  ;;  %v148_v7 = vpop.permute.xlu1 %147 }
  0xe6   :  { %v1664_v22 = vpop.f32.mrb[0].mxu0 }
  0xe7   :  { %v292_v23 = vadd.f32 %v1664_v22, %v93_v16  ;;  %v283_v24 = vpop.f32.mrb[1].mxu0  ;;  %v158_v22 = vpop.permute.xlu1 %157 }
  0xe8   :  { %v284_v26 = vadd.f32 %v283_v24, %v83_v15  ;;  %v1665_v27 = vpop.f32.mrb[2].mxu0  ;;  %v153_v15 = vpop.permute.xlu0 %152 }
  0xe9   :  { %v348_v28 = vmul.f32 0.2, %v292_v23  ;;  %v295_v29 = vadd.f32 %v1665_v27, %v98_v18  ;;  %v286_v30 = vpop.f32.mrb[3].mxu0 }
  0xea   :  { %v346_v31 = vmul.f32 0.2, %v284_v26  ;;  %v287_v33 = vadd.f32 %v286_v30, %v88_v17 }
  0xeb   :  { %v349_v32 = vmul.f32 0.2, %v295_v29  ;;  %v364_v35 = vmax.f32 %v292_v23, %v348_v28 }
  0xec   :  { %v347_v37 = vmul.f32 0.2, %v287_v33  ;;  %v362_v40 = vmax.f32 %v284_v26, %v346_v31 }
  0xed   :  { %v365_v36 = vmax.f32 %v295_v29, %v349_v32 }
  0xee   :  { %v1668_v39 = vpop.f32.mrb[4].mxu0  ;;  %v363_v41 = vmax.f32 %v287_v33, %v347_v37 }
  0xef   :  { %v308_v42 = vadd.f32 %v1668_v39, %v113_v21  ;;  %v299_v43 = vpop.f32.mrb[5].mxu0  ;;  %v395_v44 = vpack.c.bf16 %v365_v36, %v364_v35  ;;  %v1839_v39 = vld [vmem:[%s2310_s3 + $0x8] sm:$0xff]  }
  0xf0   :  { %v300_v45 = vadd.f32 %v299_v43, %v103_v19  ;;  %v1669_v46 = vpop.f32.mrb[6].mxu0  ;;  %v394_v49 = vpack.c.bf16 %v363_v41, %v362_v40  ;;  %v1840_v40 = vld [vmem:[%s2310_s3 + $0x10] sm:$0xff]   ;;  %v1841_v41 = vld [vmem:[%s2310_s3 + $0x18] sm:$0xff]   ;;  %v1843_v43 = vld [vmem:[%s2310_s3 + $0x28] sm:$0xff]  }
  0xf1   :  { %v352_v47 = vmul.f32 0.2, %v308_v42  ;;  %v311_v48 = vadd.f32 %v1669_v46, %v118_v25  ;;  %v302_v51 = vpop.f32.mrb[7].mxu0  ;;  %v1846_v46 = vld [vmem:[%s2312_s5] sm:$0xff]  }
  0xf2   :  { %v350_v52 = vmul.f32 0.2, %v300_v45  ;;  %v303_v54 = vadd.f32 %v302_v51, %v108_v20  ;;  %1678 = vmatprep.subr.bf16.mxu1 %v394_v49  ;;  %1726 = vmatprep.mubr.bf16.mxu0 %v1846_v46 }
  0xf3   :  { %v353_v53 = vmul.f32 0.2, %v311_v48  ;;  %1679 = vmatpush3.bf16.msra.mxu1 %v394_v49  ;;  %v368_v56 = vmax.f32 %v308_v42, %v352_v47  ;;  %v1842_v42 = vld [vmem:[%s2310_s3 + $0x20] sm:$0xff]   ;;  %v421_v47 = vpop.permute.xlu0 %420 }
  0xf4   :  { %v351_v58 = vmul.f32 0.2, %v303_v54  ;;  %1680 = vmatprep.subr.bf16.mxu1 %v395_v44  ;;  %v366_v60 = vmax.f32 %v300_v45, %v350_v52  ;;  %v1845_v45 = vld [vmem:[%s2310_s3 + $0x38] sm:$0xff]  }
  0xf5   :  { %v369_v57 = vmax.f32 %v311_v48, %v353_v53  ;;  %v426_v48 = vpop.permute.xlu1 %425 }
  0xf6   :  { %v1672_v59 = vpop.f32.mrb[8].mxu0  ;;  %v367_v61 = vmax.f32 %v303_v54, %v351_v58 }
  0xf7   :  { %v324_v62 = vadd.f32 %v1672_v59, %v133_v50  ;;  %v315_v63 = vpop.f32.mrb[9].mxu0  ;;  %v397_v0 = vpack.c.bf16 %v369_v57, %v368_v56  ;;  %1681 = vmatpush3.bf16.msra.mxu1 %v395_v44  ;;  %v1844_v44 = vld [vmem:[%s2310_s3 + $0x30] sm:$0xff]   ;;  %v431_v49 = vpop.permute.xlu0 %430 }
  0xf8   :  { %v316_v2 = vadd.f32 %v315_v63, %v123_v34  ;;  %v1673_v3 = vpop.f32.mrb[10].mxu0  ;;  %v396_v6 = vpack.c.bf16 %v367_v61, %v366_v60 }
  0xf9   :  { %v356_v4 = vmul.f32 0.2, %v324_v62  ;;  %v327_v5 = vadd.f32 %v1673_v3, %v138_v55  ;;  %v318_v8 = vpop.f32.mrb[11].mxu0  ;;  %v436_v50 = vpop.permute.xlu1 %435 }
  0xfa   :  { %v354_v9 = vmul.f32 0.2, %v316_v2  ;;  %v319_v11 = vadd.f32 %v318_v8, %v128_v38  ;;  %1682 = vmatprep.subr.bf16.mxu1 %v396_v6 }
  0xfb   :  { %v357_v10 = vmul.f32 0.2, %v327_v5  ;;  %1683 = vmatpush3.bf16.msra.mxu1 %v396_v6  ;;  %v372_v12 = vmax.f32 %v324_v62, %v356_v4  ;;  %v441_v51 = vpop.permute.xlu0 %440 }
  0xfc   :  { %v355_v14 = vmul.f32 0.2, %v319_v11  ;;  %1684 = vmatprep.subr.bf16.mxu1 %v397_v0  ;;  %v370_v17 = vmax.f32 %v316_v2, %v354_v9 }
  0xfd   :  { %v373_v13 = vmax.f32 %v327_v5, %v357_v10  ;;  %v446_v52 = vpop.permute.xlu1 %445 }
  0xfe   :  { %v1676_v16 = vpop.f32.mrb[12].mxu0  ;;  %v371_v18 = vmax.f32 %v319_v11, %v355_v14 }
  0xff   :  { %v340_v19 = vadd.f32 %v1676_v16, %v153_v15  ;;  %v331_v20 = vpop.f32.mrb[13].mxu0  ;;  %v399_v21 = vpack.c.bf16 %v373_v13, %v372_v12  ;;  %1685 = vmatpush3.bf16.msra.mxu1 %v397_v0  ;;  %v451_v53 = vpop.permute.xlu0 %450 }
 0x100   :  { %v332_v23 = vadd.f32 %v331_v20, %v143_v1  ;;  %v1677_v24 = vpop.f32.mrb[14].mxu0  ;;  %v398_v28 = vpack.c.bf16 %v371_v18, %v370_v17 }
 0x101   :  { %v360_v25 = vmul.f32 0.2, %v340_v19  ;;  %v343_v26 = vadd.f32 %v1677_v24, %v158_v22  ;;  %v334_v27 = vpop.f32.mrb[15].mxu0  ;;  %v456_v57 = vpop.permute.xlu1 %455 }
 0x102   :  { %v358_v29 = vmul.f32 0.2, %v332_v23  ;;  %v335_v30 = vadd.f32 %v334_v27, %v148_v7  ;;  %1686 = vmatprep.subr.bf16.mxu1 %v398_v28 }
 0x103   :  { %v361_v31 = vmul.f32 0.2, %v343_v26  ;;  %1687 = vmatpush3.bf16.msra.mxu1 %v398_v28  ;;  %v376_v33 = vmax.f32 %v340_v19, %v360_v25  ;;  %v461_v2 = vpop.permute.xlu0 %460 }
 0x104   :  { %v359_v32 = vmul.f32 0.2, %v335_v30  ;;  %1688 = vmatprep.subr.bf16.mxu1 %v399_v21  ;;  %v374_v35 = vmax.f32 %v332_v23, %v358_v29 }
 0x105   :  { %v377_v34 = vmax.f32 %v343_v26, %v361_v31  ;;  %v466_v6 = vpop.permute.xlu1 %465 }
 0x106   :  { %v375_v36 = vmax.f32 %v335_v30, %v359_v32 }
 0x107   :  { %v401_v37 = vpack.c.bf16 %v377_v34, %v376_v33  ;;  %1689 = vmatpush3.bf16.msra.mxu1 %v399_v21  ;;  %v471_v19 = vpop.permute.xlu0 %470 }
 0x108   :  { %v400_v38 = vpack.c.bf16 %v375_v36, %v374_v35 }
 0x109   :  { %v476_v23 = vpop.permute.xlu1 %475 }
 0x10a   :  { %1690 = vmatprep.subr.bf16.mxu1 %v400_v38 }
 0x10b   :  { %1691 = vmatpush3.bf16.msra.mxu1 %v400_v38  ;;  %v481_v33 = vpop.permute.xlu0 %480 }
 0x10c   :  { %1692 = vmatprep.subr.bf16.mxu1 %v401_v37 }
 0x10f   :  { %1693 = vmatpush3.bf16.msra.mxu1 %v401_v37 }
 0x112   :  { %1695 = vmatmul.mubr.bf16.vlgmr.msra.gmra.mrb[0].mxu1 %v1839_v39 }
 0x113   :  { %1698 = vmatprep.mubr.bf16.mxu1 %v1840_v40  ;;  %v486_v40 = vpop.permute.xlu1 %485 }
 0x11a   :  { %1699 = vmatmul.mubr.bf16.gmra.mrb[4].mxu1 %v1841_v41 }
 0x11b   :  { %1702 = vmatprep.mubr.bf16.mxu1 %v1842_v42 }
 0x122   :  { %1703 = vmatmul.mubr.bf16.gmra.mrb[8].mxu1 %v1843_v43 }
 0x123   :  { %1706 = vmatprep.mubr.bf16.mxu1 %v1844_v44 }
 0x12a   :  { %1707 = vmatmul.mubr.bf16.gmra.mrb[12].mxu1 %v1845_v45 }
 0x1e5   :  { %v1696_v54 = vpop.f32.mrb[0].mxu1 }
 0x1e6   :  { %v589_v55 = vadd.f32 %v1696_v54, %v431_v49  ;;  %v580_v56 = vpop.f32.mrb[1].mxu1  ;;  %v496_v54 = vpop.permute.xlu1 %495 }
 0x1e7   :  { %v581_v58 = vadd.f32 %v580_v56, %v421_v47  ;;  %v1697_v59 = vpop.f32.mrb[2].mxu1  ;;  %v491_v47 = vpop.permute.xlu0 %490 }
 0x1e8   :  { %v645_v60 = vmul.f32 0.2, %v589_v55  ;;  %v592_v61 = vadd.f32 %v1697_v59, %v436_v50  ;;  %v583_v62 = vpop.f32.mrb[3].mxu1 }
 0x1e9   :  { %v643_v63 = vmul.f32 0.2, %v581_v58  ;;  %v584_v0 = vadd.f32 %v583_v62, %v426_v48 }
 0x1ea   :  { %v646_v1 = vmul.f32 0.2, %v592_v61  ;;  %v661_v4 = vmax.f32 %v589_v55, %v645_v60 }
 0x1eb   :  { %v644_v3 = vmul.f32 0.2, %v584_v0  ;;  %v659_v7 = vmax.f32 %v581_v58, %v643_v63 }
 0x1ec   :  { %v662_v5 = vmax.f32 %v592_v61, %v646_v1 }
 0x1ed   :  { %v660_v8 = vmax.f32 %v584_v0, %v644_v3  ;;  %v1700_v9 = vpop.f32.mrb[4].mxu1 }
 0x1ee   :  { %v605_v10 = vadd.f32 %v1700_v9, %v451_v53  ;;  %v596_v11 = vpop.f32.mrb[5].mxu1  ;;  %v692_v12 = vpack.c.bf16 %v662_v5, %v661_v4  ;;  %v1849_v9 = vld [vmem:[%s2312_s5 + $0x18] sm:$0xff]  }
 0x1ef   :  { %v597_v13 = vadd.f32 %v596_v11, %v441_v51  ;;  %v1701_v14 = vpop.f32.mrb[6].mxu1  ;;  %v691_v15 = vpack.c.bf16 %v660_v8, %v659_v7  ;;  %v1847_v7 = vld [vmem:[%s2312_s5 + $0x8] sm:$0xff]   ;;  %v1848_v8 = vld [vmem:[%s2312_s5 + $0x10] sm:$0xff]  }
 0x1f0   :  { %v649_v16 = vmul.f32 0.2, %v605_v10  ;;  %v608_v17 = vadd.f32 %v1701_v14, %v456_v57  ;;  %v599_v18 = vpop.f32.mrb[7].mxu1  ;;  %v1851_v11 = vld [vmem:[%s2312_s5 + $0x28] sm:$0xff]   ;;  %v1854_v14 = vld [vmem:[%s2314_s7] sm:$0xff]  }
 0x1f1   :  { %v647_v20 = vmul.f32 0.2, %v597_v13  ;;  %v600_v21 = vadd.f32 %v599_v18, %v446_v52  ;;  %1710 = vmatprep.subr.bf16.mxu0 %v691_v15  ;;  %1758 = vmatprep.mubr.bf16.mxu1 %v1854_v14 }
 0x1f2   :  { %v650_v22 = vmul.f32 0.2, %v608_v17  ;;  %1711 = vmatpush3.bf16.msra.mxu0 %v691_v15  ;;  %v665_v25 = vmax.f32 %v605_v10, %v649_v16  ;;  %v1850_v10 = vld [vmem:[%s2312_s5 + $0x20] sm:$0xff]   ;;  %v718_v15 = vpop.permute.xlu0 %717  ;;  %v723_v16 = vpop.permute.xlu1 %722 }
 0x1f3   :  { %v648_v24 = vmul.f32 0.2, %v600_v21  ;;  %1712 = vmatprep.subr.bf16.mxu0 %v692_v12  ;;  %v663_v27 = vmax.f32 %v597_v13, %v647_v20  ;;  %v1853_v13 = vld [vmem:[%s2312_s5 + $0x38] sm:$0xff]  }
 0x1f4   :  { %v666_v26 = vmax.f32 %v608_v17, %v650_v22 }
 0x1f5   :  { %v664_v28 = vmax.f32 %v600_v21, %v648_v24  ;;  %v1704_v29 = vpop.f32.mrb[8].mxu1 }
 0x1f6   :  { %v621_v30 = vadd.f32 %v1704_v29, %v471_v19  ;;  %v612_v31 = vpop.f32.mrb[9].mxu1  ;;  %1713 = vmatpush3.bf16.msra.mxu0 %v692_v12  ;;  %v694_v32 = vpack.c.bf16 %v666_v26, %v665_v25  ;;  %v1852_v12 = vld [vmem:[%s2312_s5 + $0x30] sm:$0xff]   ;;  %v728_v17 = vpop.permute.xlu0 %727 }
 0x1f7   :  { %v613_v34 = vadd.f32 %v612_v31, %v461_v2  ;;  %v1705_v35 = vpop.f32.mrb[10].mxu1  ;;  %v693_v36 = vpack.c.bf16 %v664_v28, %v663_v27  ;;  %v733_v18 = vpop.permute.xlu1 %732 }
 0x1f8   :  { %v653_v37 = vmul.f32 0.2, %v621_v30  ;;  %v624_v38 = vadd.f32 %v1705_v35, %v476_v23  ;;  %v615_v39 = vpop.f32.mrb[11].mxu1 }
 0x1f9   :  { %v651_v41 = vmul.f32 0.2, %v613_v34  ;;  %v616_v42 = vadd.f32 %v615_v39, %v466_v6  ;;  %1714 = vmatprep.subr.bf16.mxu0 %v693_v36 }
 0x1fa   :  { %v654_v43 = vmul.f32 0.2, %v624_v38  ;;  %1715 = vmatpush3.bf16.msra.mxu0 %v693_v36  ;;  %v669_v45 = vmax.f32 %v621_v30, %v653_v37  ;;  %v738_v19 = vpop.permute.xlu0 %737 }
 0x1fb   :  { %v652_v44 = vmul.f32 0.2, %v616_v42  ;;  %1716 = vmatprep.subr.bf16.mxu0 %v694_v32  ;;  %v667_v48 = vmax.f32 %v613_v34, %v651_v41  ;;  %v743_v20 = vpop.permute.xlu1 %742 }
 0x1fc   :  { %v670_v46 = vmax.f32 %v624_v38, %v654_v43 }
 0x1fd   :  { %v668_v49 = vmax.f32 %v616_v42, %v652_v44  ;;  %v1708_v50 = vpop.f32.mrb[12].mxu1 }
 0x1fe   :  { %v637_v51 = vadd.f32 %v1708_v50, %v491_v47  ;;  %v628_v52 = vpop.f32.mrb[13].mxu1  ;;  %1717 = vmatpush3.bf16.msra.mxu0 %v694_v32  ;;  %v696_v53 = vpack.c.bf16 %v670_v46, %v669_v45  ;;  %v748_v21 = vpop.permute.xlu0 %747 }
 0x1ff   :  { %v629_v55 = vadd.f32 %v628_v52, %v481_v33  ;;  %v1709_v56 = vpop.f32.mrb[14].mxu1  ;;  %v695_v57 = vpack.c.bf16 %v668_v49, %v667_v48  ;;  %v753_v25 = vpop.permute.xlu1 %752 }
 0x200   :  { %v657_v58 = vmul.f32 0.2, %v637_v51  ;;  %v640_v59 = vadd.f32 %v1709_v56, %v496_v54  ;;  %v631_v60 = vpop.f32.mrb[15].mxu1 }
 0x201   :  { %v655_v61 = vmul.f32 0.2, %v629_v55  ;;  %v632_v62 = vadd.f32 %v631_v60, %v486_v40  ;;  %1718 = vmatprep.subr.bf16.mxu0 %v695_v57 }
 0x202   :  { %v658_v63 = vmul.f32 0.2, %v640_v59  ;;  %1719 = vmatpush3.bf16.msra.mxu0 %v695_v57  ;;  %v673_v1 = vmax.f32 %v637_v51, %v657_v58  ;;  %v758_v34 = vpop.permute.xlu0 %757 }
 0x203   :  { %v656_v0 = vmul.f32 0.2, %v632_v62  ;;  %1720 = vmatprep.subr.bf16.mxu0 %v696_v53  ;;  %v671_v3 = vmax.f32 %v629_v55, %v655_v61  ;;  %v763_v38 = vpop.permute.xlu1 %762 }
 0x204   :  { %v674_v2 = vmax.f32 %v640_v59, %v658_v63 }
 0x205   :  { %v672_v4 = vmax.f32 %v632_v62, %v656_v0 }
 0x206   :  { %1721 = vmatpush3.bf16.msra.mxu0 %v696_v53  ;;  %v698_v5 = vpack.c.bf16 %v674_v2, %v673_v1  ;;  %v768_v51 = vpop.permute.xlu0 %767 }
 0x207   :  { %v697_v6 = vpack.c.bf16 %v672_v4, %v671_v3  ;;  %v773_v55 = vpop.permute.xlu1 %772 }
 0x209   :  { %1722 = vmatprep.subr.bf16.mxu0 %v697_v6 }
 0x20a   :  { %1723 = vmatpush3.bf16.msra.mxu0 %v697_v6  ;;  %v778_v1 = vpop.permute.xlu0 %777 }
 0x20b   :  { %1724 = vmatprep.subr.bf16.mxu0 %v698_v5 }
 0x20e   :  { %1725 = vmatpush3.bf16.msra.mxu0 %v698_v5 }
 0x211   :  { %1727 = vmatmul.mubr.bf16.vlgmr.msra.gmra.mrb[16].mxu0 %v1847_v7 }
 0x212   :  { %1730 = vmatprep.mubr.bf16.mxu0 %v1848_v8  ;;  %v783_v8 = vpop.permute.xlu1 %782 }
 0x219   :  { %1731 = vmatmul.mubr.bf16.gmra.mrb[20].mxu0 %v1849_v9 }
 0x21a   :  { %1734 = vmatprep.mubr.bf16.mxu0 %v1850_v10 }
 0x221   :  { %1735 = vmatmul.mubr.bf16.gmra.mrb[24].mxu0 %v1851_v11 }
 0x222   :  { %1738 = vmatprep.mubr.bf16.mxu0 %v1852_v12 }
 0x229   :  { %1739 = vmatmul.mubr.bf16.gmra.mrb[28].mxu0 %v1853_v13 }
 0x2e4   :  { %v1728_v22 = vpop.f32.mrb[16].mxu0 }
 0x2e5   :  { %v886_v23 = vadd.f32 %v1728_v22, %v728_v17  ;;  %v877_v24 = vpop.f32.mrb[17].mxu0  ;;  %v793_v22 = vpop.permute.xlu1 %792 }
 0x2e6   :  { %v878_v26 = vadd.f32 %v877_v24, %v718_v15  ;;  %v1729_v27 = vpop.f32.mrb[18].mxu0  ;;  %v788_v15 = vpop.permute.xlu0 %787 }
 0x2e7   :  { %v942_v28 = vmul.f32 0.2, %v886_v23  ;;  %v889_v29 = vadd.f32 %v1729_v27, %v733_v18  ;;  %v880_v30 = vpop.f32.mrb[19].mxu0 }
 0x2e8   :  { %v940_v31 = vmul.f32 0.2, %v878_v26  ;;  %v881_v32 = vadd.f32 %v880_v30, %v723_v16 }
 0x2e9   :  { %v943_v33 = vmul.f32 0.2, %v889_v29  ;;  %v958_v36 = vmax.f32 %v886_v23, %v942_v28 }
 0x2ea   :  { %v941_v35 = vmul.f32 0.2, %v881_v32  ;;  %v956_v39 = vmax.f32 %v878_v26, %v940_v31 }
 0x2eb   :  { %v959_v37 = vmax.f32 %v889_v29, %v943_v33 }
 0x2ec   :  { %v957_v40 = vmax.f32 %v881_v32, %v941_v35  ;;  %v1732_v41 = vpop.f32.mrb[20].mxu0 }
 0x2ed   :  { %v902_v42 = vadd.f32 %v1732_v41, %v748_v21  ;;  %v893_v43 = vpop.f32.mrb[21].mxu0  ;;  %v989_v44 = vpack.c.bf16 %v959_v37, %v958_v36  ;;  %v1857_v41 = vld [vmem:[%s2314_s7 + $0x18] sm:$0xff]  }
 0x2ee   :  { %v894_v45 = vadd.f32 %v893_v43, %v738_v19  ;;  %v1733_v46 = vpop.f32.mrb[22].mxu0  ;;  %v988_v47 = vpack.c.bf16 %v957_v40, %v956_v39  ;;  %v1855_v39 = vld [vmem:[%s2314_s7 + $0x8] sm:$0xff]   ;;  %v1856_v40 = vld [vmem:[%s2314_s7 + $0x10] sm:$0xff]  }
 0x2ef   :  { %v946_v48 = vmul.f32 0.2, %v902_v42  ;;  %v905_v49 = vadd.f32 %v1733_v46, %v753_v25  ;;  %v896_v50 = vpop.f32.mrb[23].mxu0  ;;  %v1859_v43 = vld [vmem:[%s2314_s7 + $0x28] sm:$0xff]   ;;  %v1862_v46 = vld [vmem:[%s2316_s9] sm:$0xff]  }
 0x2f0   :  { %v944_v52 = vmul.f32 0.2, %v894_v45  ;;  %v897_v53 = vadd.f32 %v896_v50, %v743_v20  ;;  %1742 = vmatprep.subr.bf16.mxu1 %v988_v47  ;;  %1790 = vmatprep.mubr.bf16.mxu0 %v1862_v46 }
 0x2f1   :  { %v947_v54 = vmul.f32 0.2, %v905_v49  ;;  %1743 = vmatpush3.bf16.msra.mxu1 %v988_v47  ;;  %v962_v57 = vmax.f32 %v902_v42, %v946_v48  ;;  %v1858_v42 = vld [vmem:[%s2314_s7 + $0x20] sm:$0xff]   ;;  %v1867_v47 = vld [vmem:[%s2316_s9 + $0x30] sm:$0xff]   ;;  %v1015_v48 = vpop.permute.xlu0 %1014 }
 0x2f2   :  { %v945_v56 = vmul.f32 0.2, %v897_v53  ;;  %1744 = vmatprep.subr.bf16.mxu1 %v989_v44  ;;  %v960_v59 = vmax.f32 %v894_v45, %v944_v52  ;;  %v1861_v45 = vld [vmem:[%s2314_s7 + $0x38] sm:$0xff]  }
 0x2f3   :  { %v963_v58 = vmax.f32 %v905_v49, %v947_v54  ;;  %v1020_v49 = vpop.permute.xlu1 %1019 }
 0x2f4   :  { %v961_v60 = vmax.f32 %v897_v53, %v945_v56  ;;  %v1736_v61 = vpop.f32.mrb[24].mxu0 }
 0x2f5   :  { %v918_v62 = vadd.f32 %v1736_v61, %v768_v51  ;;  %v909_v63 = vpop.f32.mrb[25].mxu0  ;;  %1745 = vmatpush3.bf16.msra.mxu1 %v989_v44  ;;  %v991_v0 = vpack.c.bf16 %v963_v58, %v962_v57  ;;  %v1860_v44 = vld [vmem:[%s2314_s7 + $0x30] sm:$0xff]   ;;  %v1025_v50 = vpop.permute.xlu0 %1024 }
 0x2f6   :  { %v910_v2 = vadd.f32 %v909_v63, %v758_v34  ;;  %v1737_v3 = vpop.f32.mrb[26].mxu0  ;;  %v990_v4 = vpack.c.bf16 %v961_v60, %v960_v59 }
 0x2f7   :  { %v950_v5 = vmul.f32 0.2, %v918_v62  ;;  %v921_v6 = vadd.f32 %v1737_v3, %v773_v55  ;;  %v912_v7 = vpop.f32.mrb[27].mxu0  ;;  %v1030_v51 = vpop.permute.xlu1 %1029 }
 0x2f8   :  { %v948_v9 = vmul.f32 0.2, %v910_v2  ;;  %v913_v10 = vadd.f32 %v912_v7, %v763_v38  ;;  %1746 = vmatprep.subr.bf16.mxu1 %v990_v4 }
 0x2f9   :  { %v951_v11 = vmul.f32 0.2, %v921_v6  ;;  %1747 = vmatpush3.bf16.msra.mxu1 %v990_v4  ;;  %v966_v13 = vmax.f32 %v918_v62, %v950_v5  ;;  %v1035_v52 = vpop.permute.xlu0 %1034 }
 0x2fa   :  { %v949_v12 = vmul.f32 0.2, %v913_v10  ;;  %1748 = vmatprep.subr.bf16.mxu1 %v991_v0  ;;  %v964_v16 = vmax.f32 %v910_v2, %v948_v9 }
 0x2fb   :  { %v967_v14 = vmax.f32 %v921_v6, %v951_v11  ;;  %v1040_v53 = vpop.permute.xlu1 %1039 }
 0x2fc   :  { %v965_v17 = vmax.f32 %v913_v10, %v949_v12  ;;  %v1740_v18 = vpop.f32.mrb[28].mxu0 }
 0x2fd   :  { %v934_v19 = vadd.f32 %v1740_v18, %v788_v15  ;;  %v925_v20 = vpop.f32.mrb[29].mxu0  ;;  %1749 = vmatpush3.bf16.msra.mxu1 %v991_v0  ;;  %v993_v21 = vpack.c.bf16 %v967_v14, %v966_v13  ;;  %v1045_v54 = vpop.permute.xlu0 %1044 }
 0x2fe   :  { %v926_v23 = vadd.f32 %v925_v20, %v778_v1  ;;  %v1741_v24 = vpop.f32.mrb[30].mxu0  ;;  %v992_v25 = vpack.c.bf16 %v965_v17, %v964_v16 }
 0x2ff   :  { %v954_v26 = vmul.f32 0.2, %v934_v19  ;;  %v937_v27 = vadd.f32 %v1741_v24, %v793_v22  ;;  %v928_v28 = vpop.f32.mrb[31].mxu0  ;;  %v1050_v58 = vpop.permute.xlu1 %1049 }
 0x300   :  { %v952_v29 = vmul.f32 0.2, %v926_v23  ;;  %v929_v30 = vadd.f32 %v928_v28, %v783_v8  ;;  %1750 = vmatprep.subr.bf16.mxu1 %v992_v25 }
 0x301   :  { %v955_v31 = vmul.f32 0.2, %v937_v27  ;;  %1751 = vmatpush3.bf16.msra.mxu1 %v992_v25  ;;  %v970_v33 = vmax.f32 %v934_v19, %v954_v26  ;;  %v1055_v3 = vpop.permute.xlu0 %1054 }
 0x302   :  { %v953_v32 = vmul.f32 0.2, %v929_v30  ;;  %1752 = vmatprep.subr.bf16.mxu1 %v993_v21  ;;  %v968_v35 = vmax.f32 %v926_v23, %v952_v29 }
 0x303   :  { %v971_v34 = vmax.f32 %v937_v27, %v955_v31  ;;  %v1060_v7 = vpop.permute.xlu1 %1059 }
 0x304   :  { %v969_v36 = vmax.f32 %v929_v30, %v953_v32 }
 0x305   :  { %1753 = vmatpush3.bf16.msra.mxu1 %v993_v21  ;;  %v995_v37 = vpack.c.bf16 %v971_v34, %v970_v33  ;;  %v1065_v20 = vpop.permute.xlu0 %1064 }
 0x306   :  { %v994_v38 = vpack.c.bf16 %v969_v36, %v968_v35 }
 0x307   :  { %v1070_v24 = vpop.permute.xlu1 %1069 }
 0x308   :  { %1754 = vmatprep.subr.bf16.mxu1 %v994_v38 }
 0x309   :  { %1755 = vmatpush3.bf16.msra.mxu1 %v994_v38  ;;  %v1075_v34 = vpop.permute.xlu0 %1074 }
 0x30a   :  { %1756 = vmatprep.subr.bf16.mxu1 %v995_v37 }
 0x30d   :  { %1757 = vmatpush3.bf16.msra.mxu1 %v995_v37 }
 0x310   :  { %1759 = vmatmul.mubr.bf16.vlgmr.msra.gmra.mrb[16].mxu1 %v1855_v39 }
 0x311   :  { %1762 = vmatprep.mubr.bf16.mxu1 %v1856_v40 }
 0x318   :  { %1763 = vmatmul.mubr.bf16.gmra.mrb[20].mxu1 %v1857_v41  ;;  %v1080_v41 = vpop.permute.xlu1 %1079 }
 0x319   :  { %1766 = vmatprep.mubr.bf16.mxu1 %v1858_v42 }
 0x320   :  { %1767 = vmatmul.mubr.bf16.gmra.mrb[24].mxu1 %v1859_v43 }
 0x321   :  { %1770 = vmatprep.mubr.bf16.mxu1 %v1860_v44 }
 0x328   :  { %1771 = vmatmul.mubr.bf16.gmra.mrb[28].mxu1 %v1861_v45 }
 0x329   :  { %1802 = vmatprep.mubr.bf16.mxu1 %v1867_v47 }
 0x3e3   :  { %v1760_v55 = vpop.f32.mrb[16].mxu1 }
 0x3e4   :  { %v1183_v56 = vadd.f32 %v1760_v55, %v1025_v50  ;;  %v1174_v57 = vpop.f32.mrb[17].mxu1  ;;  %v1090_v55 = vpop.permute.xlu1 %1089 }
 0x3e5   :  { %v1175_v59 = vadd.f32 %v1174_v57, %v1015_v48  ;;  %v1761_v60 = vpop.f32.mrb[18].mxu1  ;;  %v1085_v48 = vpop.permute.xlu0 %1084 }
 0x3e6   :  { %v1239_v61 = vmul.f32 0.2, %v1183_v56  ;;  %v1186_v62 = vadd.f32 %v1761_v60, %v1030_v51  ;;  %v1177_v63 = vpop.f32.mrb[19].mxu1 }
 0x3e7   :  { %v1237_v0 = vmul.f32 0.2, %v1175_v59  ;;  %v1178_v1 = vadd.f32 %v1177_v63, %v1020_v49 }
 0x3e8   :  { %v1240_v2 = vmul.f32 0.2, %v1186_v62  ;;  %v1255_v5 = vmax.f32 %v1183_v56, %v1239_v61 }
 0x3e9   :  { %v1238_v4 = vmul.f32 0.2, %v1178_v1  ;;  %v1253_v8 = vmax.f32 %v1175_v59, %v1237_v0 }
 0x3ea   :  { %v1256_v6 = vmax.f32 %v1186_v62, %v1240_v2 }
 0x3eb   :  { %v1254_v9 = vmax.f32 %v1178_v1, %v1238_v4  ;;  %v1764_v10 = vpop.f32.mrb[20].mxu1 }
 0x3ec   :  { %v1286_v11 = vpack.c.bf16 %v1256_v6, %v1255_v5  ;;  %v1199_v12 = vadd.f32 %v1764_v10, %v1045_v54  ;;  %v1190_v13 = vpop.f32.mrb[21].mxu1  ;;  %v1864_v10 = vld [vmem:[%s2316_s9 + $0x10] sm:$0xff]  }
 0x3ed   :  { %v1285_v14 = vpack.c.bf16 %v1254_v9, %v1253_v8  ;;  %v1191_v15 = vadd.f32 %v1190_v13, %v1035_v52  ;;  %v1765_v16 = vpop.f32.mrb[22].mxu1  ;;  %v1863_v8 = vld [vmem:[%s2316_s9 + $0x8] sm:$0xff]   ;;  %v1869_v9 = vld [vmem:[%s2316_s9 + $0x38] sm:$0xff]  }
 0x3ee   :  { %v1243_v17 = vmul.f32 0.2, %v1199_v12  ;;  %v1202_v18 = vadd.f32 %v1765_v16, %v1050_v58  ;;  %v1193_v19 = vpop.f32.mrb[23].mxu1  ;;  %v1868_v13 = vld [vmem:[%s2316_s9 + $0x28] sm:$0xff]  }
 0x3ef   :  { %v1241_v21 = vmul.f32 0.2, %v1191_v15  ;;  %v1194_v22 = vadd.f32 %v1193_v19, %v1040_v53  ;;  %1774 = vmatprep.subr.bf16.mxu0 %v1285_v14  ;;  %1806 = vmatprep.subr.bf16.mxu1 %v1285_v14 }
 0x3f0   :  { %v1244_v23 = vmul.f32 0.2, %v1202_v18  ;;  %1775 = vmatpush3.bf16.msra.mxu0 %v1285_v14  ;;  %1814 = vmatpush3.bf16.msra.mxu1 %v1285_v14  ;;  %v1259_v26 = vmax.f32 %v1199_v12, %v1243_v17  ;;  %v1866_v12 = vld [vmem:[%s2316_s9 + $0x20] sm:$0xff]   ;;  %v1312_v14 = vpop.permute.xlu0 %1311 }
 0x3f1   :  { %v1242_v25 = vmul.f32 0.2, %v1194_v22  ;;  %1776 = vmatprep.subr.bf16.mxu0 %v1286_v11  ;;  %1807 = vmatprep.subr.bf16.mxu1 %v1286_v11  ;;  %v1257_v28 = vmax.f32 %v1191_v15, %v1241_v21 }
 0x3f2   :  { %v1260_v27 = vmax.f32 %v1202_v18, %v1244_v23 }
 0x3f3   :  { %v1258_v29 = vmax.f32 %v1194_v22, %v1242_v25  ;;  %v1768_v30 = vpop.f32.mrb[24].mxu1 }
 0x3f4   :  { %v1288_v31 = vpack.c.bf16 %v1260_v27, %v1259_v26  ;;  %v1215_v32 = vadd.f32 %v1768_v30, %v1065_v20  ;;  %v1206_v33 = vpop.f32.mrb[25].mxu1  ;;  %1777 = vmatpush3.bf16.msra.mxu0 %v1286_v11  ;;  %1815 = vmatpush3.bf16.msra.mxu1 %v1286_v11  ;;  %v1865_v11 = vld [vmem:[%s2316_s9 + $0x18] sm:$0xff]   ;;  %s1899_s9 = smov [#allocation2]  }
 0x3f5   :  { %v1287_v35 = vpack.c.bf16 %v1258_v29, %v1257_v28  ;;  %v1207_v36 = vadd.f32 %v1206_v33, %v1055_v3  ;;  %v1769_v37 = vpop.f32.mrb[26].mxu1  ;;  %s1518_s23 = sshll.u32 %s1899_s9, 4  ;;  %s1519_s23 = int_to_ptr.vmem [resolvable:$true] %s1518_s23 }
 0x3f6   :  { %v1247_v38 = vmul.f32 0.2, %v1215_v32  ;;  %v1218_v39 = vadd.f32 %v1769_v37, %v1070_v24  ;;  %v1209_v40 = vpop.f32.mrb[27].mxu1  ;;  %s1874_s24 = scalar_lea.vmem %s1519_s23, 16  ;;  %s1878_s25 = scalar_lea.vmem %s1519_s23, 32 }
 0x3f7   :  { %v1245_v42 = vmul.f32 0.2, %v1207_v36  ;;  %v1210_v43 = vadd.f32 %v1209_v40, %v1060_v7  ;;  %1778 = vmatprep.subr.bf16.mxu0 %v1287_v35  ;;  %1808 = vmatprep.subr.bf16.mxu1 %v1287_v35  ;;  %p1875_p0 = scmp.ne.s32.totalorder %s1519_s23, %s1874_s24  ;;  %p1879_p1 = scmp.lt.s32.totalorder %s1519_s23, %s1519_s23 }
 0x3f8   :  { %v1248_v44 = vmul.f32 0.2, %v1218_v39  ;;  %1779 = vmatpush3.bf16.msra.mxu0 %v1287_v35  ;;  %1816 = vmatpush3.bf16.msra.mxu1 %v1287_v35  ;;  %v1263_v46 = vmax.f32 %v1215_v32, %v1247_v38  ;;  %p1880_p2 = scmp.lt.s32.totalorder %s1878_s25, %s1874_s24 }
 0x3f9   :  { %v1246_v45 = vmul.f32 0.2, %v1210_v43  ;;  %1780 = vmatprep.subr.bf16.mxu0 %v1288_v31  ;;  %1809 = vmatprep.subr.bf16.mxu1 %v1288_v31  ;;  %v1261_v49 = vmax.f32 %v1207_v36, %v1245_v42 }
 0x3fa   :  { %v1264_v47 = vmax.f32 %v1218_v39, %v1248_v44  ;;  %p1881_p3 = por %p1880_p2, %p1879_p1 }
 0x3fb   :  { %v1262_v50 = vmax.f32 %v1210_v43, %v1246_v45  ;;  %v1772_v51 = vpop.f32.mrb[28].mxu1 }
 0x3fc   :  { %v1290_v52 = vpack.c.bf16 %v1264_v47, %v1263_v46  ;;  %v1231_v53 = vadd.f32 %v1772_v51, %v1085_v48  ;;  %v1222_v54 = vpop.f32.mrb[29].mxu1  ;;  %1781 = vmatpush3.bf16.msra.mxu0 %v1288_v31  ;;  %1817 = vmatpush3.bf16.msra.mxu1 %v1288_v31  ;;  %p1882_p4 = pnand %p1881_p3, %p1875_p0 }
 0x3fd   :  { %v1289_v56 = vpack.c.bf16 %v1262_v50, %v1261_v49  ;;  %v1223_v57 = vadd.f32 %v1222_v54, %v1075_v34  ;;  %v1773_v58 = vpop.f32.mrb[30].mxu1 }
 0x3fe   :  { %v1251_v59 = vmul.f32 0.2, %v1231_v53  ;;  %v1234_v60 = vadd.f32 %v1773_v58, %v1090_v55  ;;  %v1225_v61 = vpop.f32.mrb[31].mxu1 }
 0x3ff   :  { %v1249_v62 = vmul.f32 0.2, %v1223_v57  ;;  %v1226_v63 = vadd.f32 %v1225_v61, %v1080_v41  ;;  %1782 = vmatprep.subr.bf16.mxu0 %v1289_v56  ;;  %1810 = vmatprep.subr.bf16.mxu1 %v1289_v56 }
 0x400   :  { %v1252_v0 = vmul.f32 0.2, %v1234_v60  ;;  %1783 = vmatpush3.bf16.msra.mxu0 %v1289_v56  ;;  %1818 = vmatpush3.bf16.msra.mxu1 %v1289_v56  ;;  %v1267_v2 = vmax.f32 %v1231_v53, %v1251_v59 }
 0x401   :  { %v1250_v1 = vmul.f32 0.2, %v1226_v63  ;;  %1784 = vmatprep.subr.bf16.mxu0 %v1290_v52  ;;  %1811 = vmatprep.subr.bf16.mxu1 %v1290_v52  ;;  %v1265_v4 = vmax.f32 %v1223_v57, %v1249_v62 }
 0x402   :  { %v1268_v3 = vmax.f32 %v1234_v60, %v1252_v0 }
 0x403   :  { %v1266_v5 = vmax.f32 %v1226_v63, %v1250_v1 }
 0x404   :  { %v1292_v6 = vpack.c.bf16 %v1268_v3, %v1267_v2  ;;  %1785 = vmatpush3.bf16.msra.mxu0 %v1290_v52  ;;  %1819 = vmatpush3.bf16.msra.mxu1 %v1290_v52 }
 0x405   :  { %v1291_v7 = vpack.c.bf16 %v1266_v5, %v1265_v4 }
 0x407   :  { %1786 = vmatprep.subr.bf16.mxu0 %v1291_v7  ;;  %1812 = vmatprep.subr.bf16.mxu1 %v1291_v7 }
 0x408   :  { %1787 = vmatpush3.bf16.msra.mxu0 %v1291_v7  ;;  %1820 = vmatpush3.bf16.msra.mxu1 %v1291_v7 }
 0x409   :  { %1788 = vmatprep.subr.bf16.mxu0 %v1292_v6  ;;  %1813 = vmatprep.subr.bf16.mxu1 %v1292_v6 }
 0x40c   :  { %1789 = vmatpush3.bf16.msra.mxu0 %v1292_v6  ;;  %1821 = vmatpush3.bf16.msra.mxu1 %v1292_v6 }
 0x40f   :  { %1791 = vmatmul.mubr.bf16.vlgmr.msra.gmra.mrb[32].mxu0 %v1863_v8  ;;  %1803 = vmatmul.mubr.bf16.vlgmr.msra.gmra.mrb[32].mxu1 %v1869_v9 }
 0x410   :  { %1794 = vmatprep.mubr.bf16.mxu0 %v1864_v10 }
 0x417   :  { %1795 = vmatmul.mubr.bf16.gmra.mrb[36].mxu0 %v1865_v11 }
 0x418   :  { %1798 = vmatprep.mubr.bf16.mxu0 %v1866_v12 }
 0x41f   :  { %1799 = vmatmul.mubr.bf16.gmra.mrb[40].mxu0 %v1868_v13 }
 0x4e2   :  { %v1792_v15 = vpop.f32.mrb[32].mxu0  ;;  %v1804_v16 = vpop.f32.mrb[32].mxu1 }
 0x4e3   :  { %v1456_v17 = vpop.f32.mrb[33].mxu0  ;;  %v1493_v18 = vpop.f32.mrb[33].mxu1 }
 0x4e4   :  { %v1457_v19 = vadd.f32 %v1456_v17, %v1312_v14  ;;  %v1793_v20 = vpop.f32.mrb[34].mxu0  ;;  %v1805_v21 = vpop.f32.mrb[34].mxu1 }
 0x4e5   :  { %v1459_v22 = vpop.f32.mrb[35].mxu0  ;;  %v1495_v23 = vpop.f32.mrb[35].mxu1 }
 0x4e6   :  { %v1504_v24 = vsub.f32 0.0, %v1457_v19 }
 0x4e8   :  { %v1505_v25 = vmul.f32 1.442695, %v1504_v24 }
 0x4ea   :  { %1870 = vpow2.f32 %v1505_v25  ;;  %v1796_v26 = vpop.f32.mrb[36].mxu0 }
 0x4eb   :  { %v1469_v27 = vpop.f32.mrb[37].mxu0 }
 0x4ec   :  { %v1797_v28 = vpop.f32.mrb[38].mxu0 }
 0x4ed   :  { %v1471_v29 = vpop.f32.mrb[39].mxu0 }
 0x4f2   :  { %v1800_v30 = vpop.f32.mrb[40].mxu0 }
 0x4f3   :  { %v1481_v31 = vpop.f32.mrb[41].mxu0 }
 0x4f4   :  { %v1871_v32 = vpop.eup %1870  ;;  %v1801_v33 = vpop.f32.mrb[42].mxu0 }
 0x4f5   :  { %v1507_v34 = vadd.f32 1.0, %v1871_v32  ;;  %v1483_v35 = vpop.f32.mrb[43].mxu0 }
 0x4f7   :  { %1872 = vrcp.f32 %v1507_v34 }
 0x501   :  { %v1873_v36 = vpop.eup %1872 }
 0x502   :  { %1511 = vst.msk [vmem:[#allocation2] sm:$0x1] %vm1510_vm1, %v1873_v36 }
 0x503   :  { %1885 = shalt.err (!%p1882_p4)
}
 0x504   :  { %s1886_s27 = scalar_lea.hbm %s2318_s11, 16 }
 0x505   :  { %p1887_p5 = scmp.ne.s32.totalorder %s2318_s11, %s1886_s27  ;;  %p1890_p6 = scmp.lt.u32.totalorder %s1886_s27, %s2318_s11 }
 0x507   :  { %p1892_p7 = pnand %p1890_p6, %p1887_p5 }
 0x509   :  { %1895 = shalt.err (!%p1892_p7)
}
 0x50a   :  { %1521 = dma.vmem_to_hbm [thread:$0]  %s1519_s23, 16, %s2318_s11, [#allocation3]  }
 0x50b   :  { %1896 = dma.done.wait [#allocation3], 16  }
 0x50c   :  { %1897 = vsyncadd [#allocation3], 4294967280 }
 0x50d   :  { %1525 = vsyncpa [#allocation3], 1 }

</bundles_post_ra>
